<compile_context>
chip_gen: v7x
topology: tpu7x:2x2x1
jax: 0.10.0
libtpu: 0.0.40
codegen_flags: <defaults>
</compile_context>

<pallas_src>
import math
import functools
import jax
import jax.numpy as jnp
from jax.experimental import pallas as pl
from jax.experimental.pallas import tpu as pltpu

NUM_HEADS = 4
LN_EPS = 1e-5
NEG_INF = -1e30   # additive attention bias for padded keys
O_PAD = 128       # lane-dense padded width for the final FC output


# ----------------------------- fused Pallas kernel ----------------------------- #

def fused_transformer_kernel(x_in_ref, bias_ref, minv_ref,
                             wqkv_ref, bqkv_ref, wo_ref, bo_ref,
                             g1_ref, be1_ref, w1_ref, b1_ref,
                             w2_ref, b2_ref, g2_ref, be2_ref,
                             wfc_ref, bfc_ref,
                             out_ref,
                             x_scr):
    """grid = (batch_tiles, layers); layers innermost ("arbitrary").

    x lives in VMEM scratch as a 2-D (tb*S, D) slab across the layer sweep.  On the last
    layer of each batch tile we additionally do masked mean pooling + the final Linear and
    write the lane-padded logits.
    """
    layer = pl.program_id(1)
    n_layers = pl.num_programs(1)

    tb, S, D = x_in_ref.shape
    BS = tb * S
    H = NUM_HEADS
    hd = D // H
    w_dt = wqkv_ref.dtype          # f32 or bf16 (mixed-precision weight path)

    # Load the embedded + positionally-encoded input into the resident scratch once
    # per batch tile (layer index resets at each new batch tile).
    @pl.when(layer == 0)
    def _():
        x_scr[...] = x_in_ref[...].reshape(BS, D)

    x = x_scr[...]                 # (BS, D) float32, batch folded into M

    def c(a):                      # cast matmul operands to the weight dtype (no-op for f32)
        return a.astype(w_dt)

    def mm(a, w):                  # 2-D matmul, f32 accumulation on the MXU
        return jnp.dot(c(a), w, preferred_element_type=jnp.float32)

    # Fused Q|K|V projection; 1/sqrt(hd) is already folded into the Q columns.
    qkv = mm(x, wqkv_ref[...]) + bqkv_ref[...]           # (BS, 3D) f32
    bias = bias_ref[...]                                 # (tb, 1, S): 0 valid, NEG_INF pad

    # Per-head attention, accumulating directly through per-head wo blocks (no lane concat).
    attn = None
    for h in range(H):                                   # static (unrolled) head loop
        q_h = qkv[:, h * hd:(h + 1) * hd].reshape(tb, S, hd)
        k_h = qkv[:, D + h * hd:D + (h + 1) * hd].reshape(tb, S, hd)
        v_h = qkv[:, 2 * D + h * hd:2 * D + (h + 1) * hd].reshape(tb, S, hd)
        s = jnp.einsum('bqd,bkd->bqk', c(q_h), c(k_h),
                       preferred_element_type=jnp.float32) + bias     # (tb, S, S) f32
        m = jnp.max(s, axis=-1, keepdims=True)
        p = jnp.exp(s - m)
        p = p * pl.reciprocal(jnp.sum(p, axis=-1, keepdims=True), approx=True)
        ctx_h = jnp.einsum('bqk,bkd->bqd', c(p), c(v_h),
                           preferred_element_type=jnp.float32)        # (tb, S, hd)
        contrib = jnp.dot(c(ctx_h.reshape(BS, hd)), wo_ref[h],
                          preferred_element_type=jnp.float32)          # (BS, D)
        attn = contrib if attn is None else attn + contrib
    attn = attn + bo_ref[...]

    def layernorm(a, g, b):        # single-pass: var = E[x^2] - mu^2
        mu = jnp.mean(a, axis=-1, keepdims=True)
        ms = jnp.mean(a * a, axis=-1, keepdims=True)
        var = ms - mu * mu
        return (a - mu) * jax.lax.rsqrt(var + LN_EPS) * g + b

    x1 = layernorm(x + attn, g1_ref[...], be1_ref[...])
    h1 = jnp.maximum(mm(x1, w1_ref[...]) + b1_ref[...], 0.0)          # relu
    ff = mm(h1, w2_ref[...]) + b2_ref[...]
    x_new = layernorm(x1 + ff, g2_ref[...], be2_ref[...])
    x_scr[...] = x_new                                   # carry to next layer (stays in VMEM)

    # Final layer of this batch tile: masked mean pooling + final Linear (lane-padded store).
    @pl.when(layer == n_layers - 1)
    def _():
        minv = minv_ref[...]                             # (tb, S, 1): 1 valid, 0 pad
        xs = x_new.reshape(tb, S, D)
        num = jnp.sum(xs * minv, axis=1)                 # (tb, D)
        den = jnp.maximum(jnp.sum(minv, axis=1), 1e-8)   # (tb, 1)  clamp(min=1e-8)
        pooled = num / den                               # exact division (correctness note)
        out_ref[...] = (jnp.dot(c(pooled), wfc_ref[...],
                                preferred_element_type=jnp.float32) + bfc_ref[...])


# ------------------------------ wrappers ---------------------------------- #

def _const_spec(a):
    """Full-array block whose index never changes across the grid (fetched once)."""
    nd = a.ndim
    return pl.BlockSpec(a.shape, lambda b, l, _nd=nd: (0,) * _nd)


def _layer_spec(a):
    """(L, ...) stacked array: one layer's slab, leading dim squeezed, indexed by layer."""
    nd = a.ndim - 1
    return pl.BlockSpec((None,) + a.shape[1:], lambda b, l, _nd=nd: (l,) + (0,) * _nd)


def _batch_spec(a, tb):
    """(B, ...) activation/mask: one batch tile, indexed by the parallel batch axis."""
    nd = a.ndim - 1
    return pl.BlockSpec((tb,) + a.shape[1:], lambda b, l, _nd=nd: (b,) + (0,) * _nd)


def positional_encoding(S, D):
    pos = jnp.arange(S, dtype=jnp.float32)[:, None]
    div = jnp.exp(jnp.arange(0, D, 2, dtype=jnp.float32) * (-math.log(10000.0) / D))
    pe = jnp.zeros((S, D), jnp.float32)
    pe = pe.at[:, 0::2].set(jnp.sin(pos * div))
    pe = pe.at[:, 1::2].set(jnp.cos(pos * div))
    return pe


def build_fused_params(params, weight_dtype=jnp.float32):
    """Stack per-layer weights to (L, ...), fuse QKV, fold the attention scale,
    reshape wo to per-head blocks (H, hd, D), pad the FC, optionally cast big slabs."""
    D = params['embedding'].shape[1]
    H = NUM_HEADS
    hd = D // H
    scale = 1.0 / math.sqrt(hd)

    def stack(fn, dtype=None):
        a = jnp.stack([fn(p) for p in params['layers']], axis=0)
        return a.astype(dtype) if dtype is not None else a

    fused = dict(
        embedding=params['embedding'],
        wqkv=stack(lambda p: jnp.concatenate([p['wq'] * scale, p['wk'], p['wv']], axis=1),
                   weight_dtype),
        bqkv=stack(lambda p: jnp.concatenate([p['bq'] * scale, p['bk'], p['bv']], axis=1)),
        wo=stack(lambda p: p['wo'].reshape(H, hd, D), weight_dtype),
        bo=stack(lambda p: p['bo']),
        g1=stack(lambda p: p['g1']), be1=stack(lambda p: p['be1']),
        w1=stack(lambda p: p['w1'], weight_dtype), b1=stack(lambda p: p['b1']),
        w2=stack(lambda p: p['w2'], weight_dtype), b2=stack(lambda p: p['b2']),
        g2=stack(lambda p: p['g2']), be2=stack(lambda p: p['be2']),
    )
    O = params['w_fc'].shape[1]
    fused['w_fc'] = (jnp.zeros((D, O_PAD), jnp.float32)
                     .at[:, :O].set(params['w_fc']).astype(weight_dtype))
    fused['b_fc'] = jnp.zeros((1, O_PAD), jnp.float32).at[:, :O].set(params['b_fc'])
    return fused, O


@functools.partial(jax.jit, static_argnames=('out_dim', 'batch_tile'))
def transformer_forward(tokens, fp, out_dim, batch_tile=None):
    """Equivalent of TransformerWithW2VEmbedding.forward (eval mode)."""
    # glue: embedding gather + positional encoding + mask construction (plain JAX)
    mask_pad = (tokens == 0)                                    # (B, S) True at padding
    x = fp['embedding'][tokens]                                 # (B, S, D)
    B, S, D = x.shape
    x = (x + positional_encoding(S, D)[None]).astype(jnp.float32)
    # TODO(synk): dropout layers are identity here (eval-mode semantics).

    attn_bias = jnp.where(mask_pad, NEG_INF, 0.0).astype(jnp.float32)[:, None, :]   # (B,1,S)
    mask_inv = (~mask_pad).astype(jnp.float32)[:, :, None]                          # (B,S,1)

    tb = B if batch_tile is None else batch_tile                # batch tile (v7x: shard TCs)
    assert B % tb == 0
    n_bt = B // tb

    L = fp['wqkv'].shape[0]
    F = fp['w1'].shape[-1]
    layer_keys = ('wqkv', 'bqkv', 'wo', 'bo', 'g1', 'be1',
                  'w1', 'b1', 'w2', 'b2', 'g2', 'be2')

    operands = [x, attn_bias, mask_inv] + [fp[k] for k in layer_keys] \
               + [fp['w_fc'], fp['b_fc']]
    in_specs = [_batch_spec(x, tb), _batch_spec(attn_bias, tb), _batch_spec(mask_inv, tb)] \
               + [_layer_spec(fp[k]) for k in layer_keys] \
               + [_const_spec(fp['w_fc']), _const_spec(fp['b_fc'])]

    # Advisory cost estimate so XLA schedules around the custom call at real sizes.
    flops = L * (2 * B * S * D * 3 * D        # fused qkv projection
                 + 4 * B * S * S * D          # qk^T + pv (all heads)
                 + 2 * B * S * D * D          # output projection
                 + 4 * B * S * D * F)         # feed-forward
    flops += 2 * B * D * O_PAD                # final fc
    transcend = L * B * (NUM_HEADS * S * S + 2 * S)
    bytes_accessed = int(sum(int(op.size) * op.dtype.itemsize for op in operands)
                         + B * O_PAD * 4)

    logits_pad = pl.pallas_call(
        fused_transformer_kernel,
        out_shape=jax.ShapeDtypeStruct((B, O_PAD), jnp.float32),
        grid=(n_bt, L),
        in_specs=in_specs,
        out_specs=pl.BlockSpec((tb, O_PAD), lambda b, l: (b, 0)),
        scratch_shapes=[pltpu.VMEM((tb * S, D), jnp.float32)],  # activation resident in VMEM
        compiler_params=pltpu.CompilerParams(
            dimension_semantics=("parallel", "arbitrary"),      # batch ∥, layers sequential
            vmem_limit_bytes=64 * 1024 * 1024),                 # explicit budget (v7x-safe)
        cost_estimate=pl.CostEstimate(flops=flops, transcendentals=transcend,
                                      bytes_accessed=bytes_accessed),
    )(*operands)

    return {'sentiment': logits_pad[:, :out_dim]}


# --------------------------- deterministic init ---------------------------- #

def init_params(key, vocab, D, F, O, num_layers):
    ks = iter(jax.random.split(key, 64))

    def dense(shape, scale=0.02):
        return (scale * jax.random.normal(next(ks), shape)).astype(jnp.float32)

    params = {
        'embedding': dense((vocab, D), scale=0.5),
        'w_fc': dense((D, O)),
        'b_fc': jnp.zeros((1, O), jnp.float32),
        'layers': [],
    }
    for _ in range(num_layers):
        layer = dict(
            wq=dense((D, D)), wk=dense((D, D)), wv=dense((D, D)),
            bq=jnp.zeros((1, D), jnp.float32), bk=jnp.zeros((1, D), jnp.float32),
            bv=jnp.zeros((1, D), jnp.float32),
            wo=dense((D, D)), bo=jnp.zeros((1, D), jnp.float32),
            g1=jnp.ones((1, D), jnp.float32), be1=jnp.zeros((1, D), jnp.float32),
            w1=dense((D, F)), b1=jnp.zeros((1, F), jnp.float32),
            w2=dense((F, D)), b2=jnp.zeros((1, D), jnp.float32),
            g2=jnp.ones((1, D), jnp.float32), be2=jnp.zeros((1, D), jnp.float32),
        )
        params['layers'].append(layer)
    return params


# --------------------------- pure-JAX reference ---------------------------- #

def reference_forward(tokens, params):
    mask_pad = (tokens == 0)
    x = params['embedding'][tokens]
    S, D = x.shape[1], x.shape[2]
    x = x + positional_encoding(S, D)[None]
    bias = jnp.where(mask_pad, NEG_INF, 0.0).astype(jnp.float32)[:, None, :]
    H = NUM_HEADS
    hd = D // H
    scale = 1.0 / math.sqrt(hd)
    hi = jax.lax.Precision.HIGHEST

    def ln(a, g, b):
        mu = jnp.mean(a, -1, keepdims=True)
        var = jnp.mean((a - mu) ** 2, -1, keepdims=True)
        return (a - mu) * jax.lax.rsqrt(var + LN_EPS) * g + b

    for p in params['layers']:
        q = jnp.einsum('bsi,io->bso', x, p['wq'], precision=hi) + p['bq']
        k = jnp.einsum('bsi,io->bso', x, p['wk'], precision=hi) + p['bk']
        v = jnp.einsum('bsi,io->bso', x, p['wv'], precision=hi) + p['bv']
        heads = []
        for h in range(H):
            sl = slice(h * hd, (h + 1) * hd)
            s = jnp.einsum('bqd,bkd->bqk', q[:, :, sl], k[:, :, sl], precision=hi) * scale
            s = s + bias
            m = jnp.max(s, -1, keepdims=True)
            pw = jnp.exp(s - m)
            pw = pw / jnp.sum(pw, -1, keepdims=True)
            heads.append(jnp.einsum('bqk,bkd->bqd', pw, v[:, :, sl], precision=hi))
        ctx = jnp.concatenate(heads, -1)
        attn = jnp.einsum('bsi,io->bso', ctx, p['wo'], precision=hi) + p['bo']
        x1 = ln(x + attn, p['g1'], p['be1'])
        h1 = jnp.maximum(jnp.einsum('bsi,io->bso', x1, p['w1'], precision=hi) + p['b1'], 0.0)
        ff = jnp.einsum('bsi,io->bso', h1, p['w2'], precision=hi) + p['b2']
        x = ln(x1 + ff, p['g2'], p['be2'])

    minv = (~mask_pad).astype(jnp.float32)[:, :, None]
    pooled = jnp.sum(x * minv, 1) / jnp.maximum(jnp.sum(minv, 1), 1e-8)
    return jnp.dot(pooled, params['w_fc'], precision=hi) + params['b_fc']


# --------------------------------- main ------------------------------------ #

if __name__ == "__main__":
    B, S, VOCAB, D, F, O, L = 2, 8, 50, 32, 64, 8, 2

    key = jax.random.PRNGKey(0)
    k_tok, k_par = jax.random.split(key)

    tokens = jax.random.randint(k_tok, (B, S), 1, VOCAB, dtype=jnp.int32)
    # introduce padding (token id 0) like a real padded batch
    tokens = tokens.at[0, 5:].set(0)
    tokens = tokens.at[1, 7:].set(0)

    params = init_params(k_par, VOCAB, D, F, O, L)
    ref = jax.block_until_ready(reference_forward(tokens, params))

    # ---- f32 weights: strict numerical check against the f32 reference ----
    fused_f32, out_dim = build_fused_params(params, weight_dtype=jnp.float32)
    out = transformer_forward(tokens, fused_f32, out_dim)
    logits = jax.block_until_ready(out['sentiment'])
    assert logits.shape == (B, O)
    assert jnp.allclose(logits, ref, rtol=1e-3, atol=1e-3), (
        f"f32 max abs diff {jnp.max(jnp.abs(logits - ref))}")

    # ---- bf16 weights (production DMA/VMEM/MXU path): looser tolerance ----
    fused_bf16, _ = build_fused_params(params, weight_dtype=jnp.bfloat16)
    out_bf = transformer_forward(tokens, fused_bf16, out_dim)
    logits_bf = jax.block_until_ready(out_bf['sentiment'])
    assert logits_bf.shape == (B, O)
    assert jnp.allclose(logits_bf, ref, rtol=5e-2, atol=5e-2), (
        f"bf16 max abs diff {jnp.max(jnp.abs(logits_bf - ref))}")

    print("KERNEL_OK")
</pallas_src>

<mosaic_0001>
module attributes {stable_mosaic.version = 11 : i64} {
  func.func @fused_transformer_kernel(%arg0: i32, %arg1: i32, %arg2: memref<2x8x32xf32, #tpu.memory_space<vmem>>, %arg3: memref<2x1x8xf32, #tpu.memory_space<vmem>>, %arg4: memref<2x8x1xf32, #tpu.memory_space<vmem>>, %arg5: memref<1x32x96xf32, #tpu.memory_space<vmem>>, %arg6: memref<1x1x96xf32, #tpu.memory_space<vmem>>, %arg7: memref<1x4x8x32xf32, #tpu.memory_space<vmem>>, %arg8: memref<1x1x32xf32, #tpu.memory_space<vmem>>, %arg9: memref<1x1x32xf32, #tpu.memory_space<vmem>>, %arg10: memref<1x1x32xf32, #tpu.memory_space<vmem>>, %arg11: memref<1x32x64xf32, #tpu.memory_space<vmem>>, %arg12: memref<1x1x64xf32, #tpu.memory_space<vmem>>, %arg13: memref<1x64x32xf32, #tpu.memory_space<vmem>>, %arg14: memref<1x1x32xf32, #tpu.memory_space<vmem>>, %arg15: memref<1x1x32xf32, #tpu.memory_space<vmem>>, %arg16: memref<1x1x32xf32, #tpu.memory_space<vmem>>, %arg17: memref<32x128xf32, #tpu.memory_space<vmem>>, %arg18: memref<1x128xf32, #tpu.memory_space<vmem>>, %arg19: memref<2x128xf32, #tpu.memory_space<vmem>>, %arg20: memref<16x32xf32, #tpu.memory_space<vmem>>) attributes {dimension_semantics = [#tpu.dimension_semantics<parallel>, #tpu.dimension_semantics<arbitrary>], iteration_bounds = array<i64: 1, 2>, scalar_prefetch = 0 : i64, scratch_operands = 1 : i64, tpu.core_type = #tpu.core_type<tc>, window_params = [{transform_indices = @transform_0, window_bounds = array<i64: 2, 8, 32>}, {transform_indices = @transform_1, window_bounds = array<i64: 2, 1, 8>}, {transform_indices = @transform_2, window_bounds = array<i64: 2, 8, 1>}, {transform_indices = @transform_3, window_bounds = array<i64: 1, 32, 96>}, {transform_indices = @transform_4, window_bounds = array<i64: 1, 1, 96>}, {transform_indices = @transform_5, window_bounds = array<i64: 1, 4, 8, 32>}, {transform_indices = @transform_6, window_bounds = array<i64: 1, 1, 32>}, {transform_indices = @transform_7, window_bounds = array<i64: 1, 1, 32>}, {transform_indices = @transform_8, window_bounds = array<i64: 1, 1, 32>}, {transform_indices = @transform_9, window_bounds = array<i64: 1, 32, 64>}, {transform_indices = @transform_10, window_bounds = array<i64: 1, 1, 64>}, {transform_indices = @transform_11, window_bounds = array<i64: 1, 64, 32>}, {transform_indices = @transform_12, window_bounds = array<i64: 1, 1, 32>}, {transform_indices = @transform_13, window_bounds = array<i64: 1, 1, 32>}, {transform_indices = @transform_14, window_bounds = array<i64: 1, 1, 32>}, {pipeline_mode = #tpu.pipeline_mode<synchronous>, transform_indices = @transform_15, window_bounds = array<i64: 32, 128>}, {pipeline_mode = #tpu.pipeline_mode<synchronous>, transform_indices = @transform_16, window_bounds = array<i64: 1, 128>}, {transform_indices = @transform_17, window_bounds = array<i64: 2, 128>}]} {
    %c0_i32 = arith.constant 0 : i32
    %0 = arith.cmpi eq, %arg1, %c0_i32 : i32
    %1 = arith.extui %0 : i1 to i32
    %c0_i32_0 = arith.constant 0 : i32
    %2 = arith.cmpi ne, %1, %c0_i32_0 : i32
    scf.if %2 {
      %c0_87 = arith.constant 0 : index
      %c0_88 = arith.constant 0 : index
      %c0_89 = arith.constant 0 : index
      %189 = vector.load %arg2[%c0_87, %c0_88, %c0_89] : memref<2x8x32xf32, #tpu.memory_space<vmem>>, vector<2x8x32xf32>
      %190 = vector.shape_cast %189 : vector<2x8x32xf32> to vector<16x32xf32>
      %c0_90 = arith.constant 0 : index
      %c0_91 = arith.constant 0 : index
      %191 = vector.load %arg20[%c0_90, %c0_91] : memref<16x32xf32, #tpu.memory_space<vmem>>, vector<16x32xf32>
      tpu.vector_store %arg20[%c0_90, %c0_91], %190 {strides = array<i32>} : memref<16x32xf32, #tpu.memory_space<vmem>>, vector<16x32xf32>,
    } else {
    }
    %c0 = arith.constant 0 : index
    %c0_1 = arith.constant 0 : index
    %3 = vector.load %arg20[%c0, %c0_1] : memref<16x32xf32, #tpu.memory_space<vmem>>, vector<16x32xf32>
    %c0_2 = arith.constant 0 : index
    %c0_3 = arith.constant 0 : index
    %c0_4 = arith.constant 0 : index
    %4 = vector.load %arg5[%c0_2, %c0_3, %c0_4] : memref<1x32x96xf32, #tpu.memory_space<vmem>>, vector<1x32x96xf32>
    %5 = vector.shape_cast %4 : vector<1x32x96xf32> to vector<32x96xf32>
    %cst = arith.constant dense<0.000000e+00> : vector<16x96xf32>
    %6 = tpu.matmul %3, %5, %cst {dimension_numbers = #tpu.dot_dimension_numbers<[1], [0], [0], [1], [0, 0, 1, 1], [], []>} : vector<16x32xf32>, vector<32x96xf32>, vector<16x96xf32> -> vector<16x96xf32>
    %c0_5 = arith.constant 0 : index
    %c0_6 = arith.constant 0 : index
    %c0_7 = arith.constant 0 : index
    %7 = vector.load %arg6[%c0_5, %c0_6, %c0_7] : memref<1x1x96xf32, #tpu.memory_space<vmem>>, vector<1x1x96xf32>
    %8 = vector.shape_cast %7 : vector<1x1x96xf32> to vector<1x96xf32>
    %9 = vector.broadcast %8 : vector<1x96xf32> to vector<16x96xf32>
    %10 = arith.addf %6, %9 : vector<16x96xf32>
    %c0_8 = arith.constant 0 : index
    %c0_9 = arith.constant 0 : index
    %c0_10 = arith.constant 0 : index
    %11 = vector.load %arg3[%c0_8, %c0_9, %c0_10] : memref<2x1x8xf32, #tpu.memory_space<vmem>>, vector<2x1x8xf32>
    %12 = vector.extract_strided_slice %10 {offsets = [0, 0], sizes = [16, 8], strides = [1, 1]} : vector<16x96xf32> to vector<16x8xf32>
    %13 = vector.shape_cast %12 : vector<16x8xf32> to vector<2x8x8xf32>
    %14 = vector.extract_strided_slice %10 {offsets = [0, 32], sizes = [16, 8], strides = [1, 1]} : vector<16x96xf32> to vector<16x8xf32>
    %15 = vector.shape_cast %14 : vector<16x8xf32> to vector<2x8x8xf32>
    %16 = vector.extract_strided_slice %10 {offsets = [0, 64], sizes = [16, 8], strides = [1, 1]} : vector<16x96xf32> to vector<16x8xf32>
    %17 = vector.shape_cast %16 : vector<16x8xf32> to vector<2x8x8xf32>
    "tpu.trace_start"() <{level = 10 : i32, message = "bqd,bkd->bqk"}> : () -> ()
    %cst_11 = arith.constant dense<0.000000e+00> : vector<2x8x8xf32>
    %18 = tpu.matmul %13, %15, %cst_11 {dimension_numbers = #tpu.dot_dimension_numbers<[2], [2], [1], [1], [0, 0, 0, 1, 1, 1], [0], [0]>} : vector<2x8x8xf32>, vector<2x8x8xf32>, vector<2x8x8xf32> -> vector<2x8x8xf32>
    "tpu.trace_stop"() : () -> ()
    %19 = vector.broadcast %11 : vector<2x1x8xf32> to vector<2x8x8xf32>
    %20 = arith.addf %18, %19 : vector<2x8x8xf32>
    %cst_12 = arith.constant dense<0xFF800000> : vector<2x8xf32>
    %21 = vector.multi_reduction <maximumf>, %20, %cst_12 [2] : vector<2x8x8xf32> to vector<2x8xf32>
    %22 = vector.shape_cast %21 : vector<2x8xf32> to vector<2x8x1xf32>
    %23 = vector.broadcast %22 : vector<2x8x1xf32> to vector<2x8x8xf32>
    %24 = arith.subf %20, %23 : vector<2x8x8xf32>
    %25 = math.exp %24 : vector<2x8x8xf32>
    %cst_13 = arith.constant dense<0.000000e+00> : vector<2x8xf32>
    %26 = vector.multi_reduction <add>, %25, %cst_13 [2] : vector<2x8x8xf32> to vector<2x8xf32>
    %27 = vector.shape_cast %26 : vector<2x8xf32> to vector<2x8x1xf32>
    %28 = tpu.reciprocal %27 {approx = true} : vector<2x8x1xf32> -> vector<2x8x1xf32>
    %29 = vector.broadcast %28 : vector<2x8x1xf32> to vector<2x8x8xf32>
    %30 = arith.mulf %25, %29 : vector<2x8x8xf32>
    "tpu.trace_start"() <{level = 10 : i32, message = "bqk,bkd->bqd"}> : () -> ()
    %cst_14 = arith.constant dense<0.000000e+00> : vector<2x8x8xf32>
    %31 = tpu.matmul %30, %17, %cst_14 {dimension_numbers = #tpu.dot_dimension_numbers<[2], [1], [1], [2], [0, 0, 0, 1, 1, 2], [0], [0]>} : vector<2x8x8xf32>, vector<2x8x8xf32>, vector<2x8x8xf32> -> vector<2x8x8xf32>
    "tpu.trace_stop"() : () -> ()
    %32 = vector.shape_cast %31 : vector<2x8x8xf32> to vector<16x8xf32>
    %c0_15 = arith.constant 0 : index
    %c0_16 = arith.constant 0 : index
    %c0_17 = arith.constant 0 : index
    %c0_18 = arith.constant 0 : index
    %33 = vector.load %arg7[%c0_15, %c0_16, %c0_17, %c0_18] : memref<1x4x8x32xf32, #tpu.memory_space<vmem>>, vector<1x1x8x32xf32>
    %34 = vector.shape_cast %33 : vector<1x1x8x32xf32> to vector<8x32xf32>
    %cst_19 = arith.constant dense<0.000000e+00> : vector<16x32xf32>
    %35 = tpu.matmul %32, %34, %cst_19 {dimension_numbers = #tpu.dot_dimension_numbers<[1], [0], [0], [1], [0, 0, 1, 1], [], []>} : vector<16x8xf32>, vector<8x32xf32>, vector<16x32xf32> -> vector<16x32xf32>
    %36 = vector.extract_strided_slice %10 {offsets = [0, 8], sizes = [16, 8], strides = [1, 1]} : vector<16x96xf32> to vector<16x8xf32>
    %37 = vector.shape_cast %36 : vector<16x8xf32> to vector<2x8x8xf32>
    %38 = vector.extract_strided_slice %10 {offsets = [0, 40], sizes = [16, 8], strides = [1, 1]} : vector<16x96xf32> to vector<16x8xf32>
    %39 = vector.shape_cast %38 : vector<16x8xf32> to vector<2x8x8xf32>
    %40 = vector.extract_strided_slice %10 {offsets = [0, 72], sizes = [16, 8], strides = [1, 1]} : vector<16x96xf32> to vector<16x8xf32>
    %41 = vector.shape_cast %40 : vector<16x8xf32> to vector<2x8x8xf32>
    "tpu.trace_start"() <{level = 10 : i32, message = "bqd,bkd->bqk"}> : () -> ()
    %cst_20 = arith.constant dense<0.000000e+00> : vector<2x8x8xf32>
    %42 = tpu.matmul %37, %39, %cst_20 {dimension_numbers = #tpu.dot_dimension_numbers<[2], [2], [1], [1], [0, 0, 0, 1, 1, 1], [0], [0]>} : vector<2x8x8xf32>, vector<2x8x8xf32>, vector<2x8x8xf32> -> vector<2x8x8xf32>
    "tpu.trace_stop"() : () -> ()
    %43 = vector.broadcast %11 : vector<2x1x8xf32> to vector<2x8x8xf32>
    %44 = arith.addf %42, %43 : vector<2x8x8xf32>
    %cst_21 = arith.constant dense<0xFF800000> : vector<2x8xf32>
    %45 = vector.multi_reduction <maximumf>, %44, %cst_21 [2] : vector<2x8x8xf32> to vector<2x8xf32>
    %46 = vector.shape_cast %45 : vector<2x8xf32> to vector<2x8x1xf32>
    %47 = vector.broadcast %46 : vector<2x8x1xf32> to vector<2x8x8xf32>
    %48 = arith.subf %44, %47 : vector<2x8x8xf32>
    %49 = math.exp %48 : vector<2x8x8xf32>
    %cst_22 = arith.constant dense<0.000000e+00> : vector<2x8xf32>
    %50 = vector.multi_reduction <add>, %49, %cst_22 [2] : vector<2x8x8xf32> to vector<2x8xf32>
    %51 = vector.shape_cast %50 : vector<2x8xf32> to vector<2x8x1xf32>
    %52 = tpu.reciprocal %51 {approx = true} : vector<2x8x1xf32> -> vector<2x8x1xf32>
    %53 = vector.broadcast %52 : vector<2x8x1xf32> to vector<2x8x8xf32>
    %54 = arith.mulf %49, %53 : vector<2x8x8xf32>
    "tpu.trace_start"() <{level = 10 : i32, message = "bqk,bkd->bqd"}> : () -> ()
    %cst_23 = arith.constant dense<0.000000e+00> : vector<2x8x8xf32>
    %55 = tpu.matmul %54, %41, %cst_23 {dimension_numbers = #tpu.dot_dimension_numbers<[2], [1], [1], [2], [0, 0, 0, 1, 1, 2], [0], [0]>} : vector<2x8x8xf32>, vector<2x8x8xf32>, vector<2x8x8xf32> -> vector<2x8x8xf32>
    "tpu.trace_stop"() : () -> ()
    %56 = vector.shape_cast %55 : vector<2x8x8xf32> to vector<16x8xf32>
    %c0_24 = arith.constant 0 : index
    %c1 = arith.constant 1 : index
    %c0_25 = arith.constant 0 : index
    %c0_26 = arith.constant 0 : index
    %57 = vector.load %arg7[%c0_24, %c1, %c0_25, %c0_26] : memref<1x4x8x32xf32, #tpu.memory_space<vmem>>, vector<1x1x8x32xf32>
    %58 = vector.shape_cast %57 : vector<1x1x8x32xf32> to vector<8x32xf32>
    %cst_27 = arith.constant dense<0.000000e+00> : vector<16x32xf32>
    %59 = tpu.matmul %56, %58, %cst_27 {dimension_numbers = #tpu.dot_dimension_numbers<[1], [0], [0], [1], [0, 0, 1, 1], [], []>} : vector<16x8xf32>, vector<8x32xf32>, vector<16x32xf32> -> vector<16x32xf32>
    %60 = arith.addf %35, %59 : vector<16x32xf32>
    %61 = vector.extract_strided_slice %10 {offsets = [0, 16], sizes = [16, 8], strides = [1, 1]} : vector<16x96xf32> to vector<16x8xf32>
    %62 = vector.shape_cast %61 : vector<16x8xf32> to vector<2x8x8xf32>
    %63 = vector.extract_strided_slice %10 {offsets = [0, 48], sizes = [16, 8], strides = [1, 1]} : vector<16x96xf32> to vector<16x8xf32>
    %64 = vector.shape_cast %63 : vector<16x8xf32> to vector<2x8x8xf32>
    %65 = vector.extract_strided_slice %10 {offsets = [0, 80], sizes = [16, 8], strides = [1, 1]} : vector<16x96xf32> to vector<16x8xf32>
    %66 = vector.shape_cast %65 : vector<16x8xf32> to vector<2x8x8xf32>
    "tpu.trace_start"() <{level = 10 : i32, message = "bqd,bkd->bqk"}> : () -> ()
    %cst_28 = arith.constant dense<0.000000e+00> : vector<2x8x8xf32>
    %67 = tpu.matmul %62, %64, %cst_28 {dimension_numbers = #tpu.dot_dimension_numbers<[2], [2], [1], [1], [0, 0, 0, 1, 1, 1], [0], [0]>} : vector<2x8x8xf32>, vector<2x8x8xf32>, vector<2x8x8xf32> -> vector<2x8x8xf32>
    "tpu.trace_stop"() : () -> ()
    %68 = vector.broadcast %11 : vector<2x1x8xf32> to vector<2x8x8xf32>
    %69 = arith.addf %67, %68 : vector<2x8x8xf32>
    %cst_29 = arith.constant dense<0xFF800000> : vector<2x8xf32>
    %70 = vector.multi_reduction <maximumf>, %69, %cst_29 [2] : vector<2x8x8xf32> to vector<2x8xf32>
    %71 = vector.shape_cast %70 : vector<2x8xf32> to vector<2x8x1xf32>
    %72 = vector.broadcast %71 : vector<2x8x1xf32> to vector<2x8x8xf32>
    %73 = arith.subf %69, %72 : vector<2x8x8xf32>
    %74 = math.exp %73 : vector<2x8x8xf32>
    %cst_30 = arith.constant dense<0.000000e+00> : vector<2x8xf32>
    %75 = vector.multi_reduction <add>, %74, %cst_30 [2] : vector<2x8x8xf32> to vector<2x8xf32>
    %76 = vector.shape_cast %75 : vector<2x8xf32> to vector<2x8x1xf32>
    %77 = tpu.reciprocal %76 {approx = true} : vector<2x8x1xf32> -> vector<2x8x1xf32>
    %78 = vector.broadcast %77 : vector<2x8x1xf32> to vector<2x8x8xf32>
    %79 = arith.mulf %74, %78 : vector<2x8x8xf32>
    "tpu.trace_start"() <{level = 10 : i32, message = "bqk,bkd->bqd"}> : () -> ()
    %cst_31 = arith.constant dense<0.000000e+00> : vector<2x8x8xf32>
    %80 = tpu.matmul %79, %66, %cst_31 {dimension_numbers = #tpu.dot_dimension_numbers<[2], [1], [1], [2], [0, 0, 0, 1, 1, 2], [0], [0]>} : vector<2x8x8xf32>, vector<2x8x8xf32>, vector<2x8x8xf32> -> vector<2x8x8xf32>
    "tpu.trace_stop"() : () -> ()
    %81 = vector.shape_cast %80 : vector<2x8x8xf32> to vector<16x8xf32>
    %c0_32 = arith.constant 0 : index
    %c2 = arith.constant 2 : index
    %c0_33 = arith.constant 0 : index
    %c0_34 = arith.constant 0 : index
    %82 = vector.load %arg7[%c0_32, %c2, %c0_33, %c0_34] : memref<1x4x8x32xf32, #tpu.memory_space<vmem>>, vector<1x1x8x32xf32>
    %83 = vector.shape_cast %82 : vector<1x1x8x32xf32> to vector<8x32xf32>
    %cst_35 = arith.constant dense<0.000000e+00> : vector<16x32xf32>
    %84 = tpu.matmul %81, %83, %cst_35 {dimension_numbers = #tpu.dot_dimension_numbers<[1], [0], [0], [1], [0, 0, 1, 1], [], []>} : vector<16x8xf32>, vector<8x32xf32>, vector<16x32xf32> -> vector<16x32xf32>
    %85 = arith.addf %60, %84 : vector<16x32xf32>
    %86 = vector.extract_strided_slice %10 {offsets = [0, 24], sizes = [16, 8], strides = [1, 1]} : vector<16x96xf32> to vector<16x8xf32>
    %87 = vector.shape_cast %86 : vector<16x8xf32> to vector<2x8x8xf32>
    %88 = vector.extract_strided_slice %10 {offsets = [0, 56], sizes = [16, 8], strides = [1, 1]} : vector<16x96xf32> to vector<16x8xf32>
    %89 = vector.shape_cast %88 : vector<16x8xf32> to vector<2x8x8xf32>
    %90 = vector.extract_strided_slice %10 {offsets = [0, 88], sizes = [16, 8], strides = [1, 1]} : vector<16x96xf32> to vector<16x8xf32>
    %91 = vector.shape_cast %90 : vector<16x8xf32> to vector<2x8x8xf32>
    "tpu.trace_start"() <{level = 10 : i32, message = "bqd,bkd->bqk"}> : () -> ()
    %cst_36 = arith.constant dense<0.000000e+00> : vector<2x8x8xf32>
    %92 = tpu.matmul %87, %89, %cst_36 {dimension_numbers = #tpu.dot_dimension_numbers<[2], [2], [1], [1], [0, 0, 0, 1, 1, 1], [0], [0]>} : vector<2x8x8xf32>, vector<2x8x8xf32>, vector<2x8x8xf32> -> vector<2x8x8xf32>
    "tpu.trace_stop"() : () -> ()
    %93 = vector.broadcast %11 : vector<2x1x8xf32> to vector<2x8x8xf32>
    %94 = arith.addf %92, %93 : vector<2x8x8xf32>
    %cst_37 = arith.constant dense<0xFF800000> : vector<2x8xf32>
    %95 = vector.multi_reduction <maximumf>, %94, %cst_37 [2] : vector<2x8x8xf32> to vector<2x8xf32>
    %96 = vector.shape_cast %95 : vector<2x8xf32> to vector<2x8x1xf32>
    %97 = vector.broadcast %96 : vector<2x8x1xf32> to vector<2x8x8xf32>
    %98 = arith.subf %94, %97 : vector<2x8x8xf32>
    %99 = math.exp %98 : vector<2x8x8xf32>
    %cst_38 = arith.constant dense<0.000000e+00> : vector<2x8xf32>
    %100 = vector.multi_reduction <add>, %99, %cst_38 [2] : vector<2x8x8xf32> to vector<2x8xf32>
    %101 = vector.shape_cast %100 : vector<2x8xf32> to vector<2x8x1xf32>
    %102 = tpu.reciprocal %101 {approx = true} : vector<2x8x1xf32> -> vector<2x8x1xf32>
    %103 = vector.broadcast %102 : vector<2x8x1xf32> to vector<2x8x8xf32>
    %104 = arith.mulf %99, %103 : vector<2x8x8xf32>
    "tpu.trace_start"() <{level = 10 : i32, message = "bqk,bkd->bqd"}> : () -> ()
    %cst_39 = arith.constant dense<0.000000e+00> : vector<2x8x8xf32>
    %105 = tpu.matmul %104, %91, %cst_39 {dimension_numbers = #tpu.dot_dimension_numbers<[2], [1], [1], [2], [0, 0, 0, 1, 1, 2], [0], [0]>} : vector<2x8x8xf32>, vector<2x8x8xf32>, vector<2x8x8xf32> -> vector<2x8x8xf32>
    "tpu.trace_stop"() : () -> ()
    %106 = vector.shape_cast %105 : vector<2x8x8xf32> to vector<16x8xf32>
    %c0_40 = arith.constant 0 : index
    %c3 = arith.constant 3 : index
    %c0_41 = arith.constant 0 : index
    %c0_42 = arith.constant 0 : index
    %107 = vector.load %arg7[%c0_40, %c3, %c0_41, %c0_42] : memref<1x4x8x32xf32, #tpu.memory_space<vmem>>, vector<1x1x8x32xf32>
    %108 = vector.shape_cast %107 : vector<1x1x8x32xf32> to vector<8x32xf32>
    %cst_43 = arith.constant dense<0.000000e+00> : vector<16x32xf32>
    %109 = tpu.matmul %106, %108, %cst_43 {dimension_numbers = #tpu.dot_dimension_numbers<[1], [0], [0], [1], [0, 0, 1, 1], [], []>} : vector<16x8xf32>, vector<8x32xf32>, vector<16x32xf32> -> vector<16x32xf32>
    %110 = arith.addf %85, %109 : vector<16x32xf32>
    %c0_44 = arith.constant 0 : index
    %c0_45 = arith.constant 0 : index
    %c0_46 = arith.constant 0 : index
    %111 = vector.load %arg8[%c0_44, %c0_45, %c0_46] : memref<1x1x32xf32, #tpu.memory_space<vmem>>, vector<1x1x32xf32>
    %112 = vector.shape_cast %111 : vector<1x1x32xf32> to vector<1x32xf32>
    %113 = vector.broadcast %112 : vector<1x32xf32> to vector<16x32xf32>
    %114 = arith.addf %110, %113 : vector<16x32xf32>
    %115 = arith.addf %3, %114 : vector<16x32xf32>
    %c0_47 = arith.constant 0 : index
    %c0_48 = arith.constant 0 : index
    %c0_49 = arith.constant 0 : index
    %116 = vector.load %arg9[%c0_47, %c0_48, %c0_49] : memref<1x1x32xf32, #tpu.memory_space<vmem>>, vector<1x1x32xf32>
    %117 = vector.shape_cast %116 : vector<1x1x32xf32> to vector<1x32xf32>
    %c0_50 = arith.constant 0 : index
    %c0_51 = arith.constant 0 : index
    %c0_52 = arith.constant 0 : index
    %118 = vector.load %arg10[%c0_50, %c0_51, %c0_52] : memref<1x1x32xf32, #tpu.memory_space<vmem>>, vector<1x1x32xf32>
    %119 = vector.shape_cast %118 : vector<1x1x32xf32> to vector<1x32xf32>
    %cst_53 = arith.constant dense<0.000000e+00> : vector<16xf32>
    %120 = vector.multi_reduction <add>, %115, %cst_53 [1] : vector<16x32xf32> to vector<16xf32>
    %121 = vector.shape_cast %120 : vector<16xf32> to vector<16x1xf32>
    %cst_54 = arith.constant 3.200000e+01 : f32
    %122 = vector.broadcast %cst_54 : f32 to vector<16x1xf32>
    %123 = arith.divf %121, %122 : vector<16x1xf32>
    %124 = arith.mulf %115, %115 : vector<16x32xf32>
    %cst_55 = arith.constant dense<0.000000e+00> : vector<16xf32>
    %125 = vector.multi_reduction <add>, %124, %cst_55 [1] : vector<16x32xf32> to vector<16xf32>
    %126 = vector.shape_cast %125 : vector<16xf32> to vector<16x1xf32>
    %cst_56 = arith.constant 3.200000e+01 : f32
    %127 = vector.broadcast %cst_56 : f32 to vector<16x1xf32>
    %128 = arith.divf %126, %127 : vector<16x1xf32>
    %129 = arith.mulf %123, %123 : vector<16x1xf32>
    %130 = arith.subf %128, %129 : vector<16x1xf32>
    %131 = vector.broadcast %123 : vector<16x1xf32> to vector<16x32xf32>
    %132 = arith.subf %115, %131 : vector<16x32xf32>
    %cst_57 = arith.constant 9.99999974E-6 : f32
    %133 = vector.broadcast %cst_57 : f32 to vector<16x1xf32>
    %134 = arith.addf %130, %133 : vector<16x1xf32>
    %135 = math.rsqrt %134 : vector<16x1xf32>
    %136 = vector.broadcast %135 : vector<16x1xf32> to vector<16x32xf32>
    %137 = arith.mulf %132, %136 : vector<16x32xf32>
    %138 = vector.broadcast %117 : vector<1x32xf32> to vector<16x32xf32>
    %139 = arith.mulf %137, %138 : vector<16x32xf32>
    %140 = vector.broadcast %119 : vector<1x32xf32> to vector<16x32xf32>
    %141 = arith.addf %139, %140 : vector<16x32xf32>
    %c0_58 = arith.constant 0 : index
    %c0_59 = arith.constant 0 : index
    %c0_60 = arith.constant 0 : index
    %142 = vector.load %arg11[%c0_58, %c0_59, %c0_60] : memref<1x32x64xf32, #tpu.memory_space<vmem>>, vector<1x32x64xf32>
    %143 = vector.shape_cast %142 : vector<1x32x64xf32> to vector<32x64xf32>
    %cst_61 = arith.constant dense<0.000000e+00> : vector<16x64xf32>
    %144 = tpu.matmul %141, %143, %cst_61 {dimension_numbers = #tpu.dot_dimension_numbers<[1], [0], [0], [1], [0, 0, 1, 1], [], []>} : vector<16x32xf32>, vector<32x64xf32>, vector<16x64xf32> -> vector<16x64xf32>
    %c0_62 = arith.constant 0 : index
    %c0_63 = arith.constant 0 : index
    %c0_64 = arith.constant 0 : index
    %145 = vector.load %arg12[%c0_62, %c0_63, %c0_64] : memref<1x1x64xf32, #tpu.memory_space<vmem>>, vector<1x1x64xf32>
    %146 = vector.shape_cast %145 : vector<1x1x64xf32> to vector<1x64xf32>
    %147 = vector.broadcast %146 : vector<1x64xf32> to vector<16x64xf32>
    %148 = arith.addf %144, %147 : vector<16x64xf32>
    %cst_65 = arith.constant 0.000000e+00 : f32
    %149 = vector.broadcast %cst_65 : f32 to vector<16x64xf32>
    %150 = arith.maximumf %148, %149 : vector<16x64xf32>
    %c0_66 = arith.constant 0 : index
    %c0_67 = arith.constant 0 : index
    %c0_68 = arith.constant 0 : index
    %151 = vector.load %arg13[%c0_66, %c0_67, %c0_68] : memref<1x64x32xf32, #tpu.memory_space<vmem>>, vector<1x64x32xf32>
    %152 = vector.shape_cast %151 : vector<1x64x32xf32> to vector<64x32xf32>
    %cst_69 = arith.constant dense<0.000000e+00> : vector<16x32xf32>
    %153 = tpu.matmul %150, %152, %cst_69 {dimension_numbers = #tpu.dot_dimension_numbers<[1], [0], [0], [1], [0, 0, 1, 1], [], []>} : vector<16x64xf32>, vector<64x32xf32>, vector<16x32xf32> -> vector<16x32xf32>
    %c0_70 = arith.constant 0 : index
    %c0_71 = arith.constant 0 : index
    %c0_72 = arith.constant 0 : index
    %154 = vector.load %arg14[%c0_70, %c0_71, %c0_72] : memref<1x1x32xf32, #tpu.memory_space<vmem>>, vector<1x1x32xf32>
    %155 = vector.shape_cast %154 : vector<1x1x32xf32> to vector<1x32xf32>
    %156 = vector.broadcast %155 : vector<1x32xf32> to vector<16x32xf32>
    %157 = arith.addf %153, %156 : vector<16x32xf32>
    %158 = arith.addf %141, %157 : vector<16x32xf32>
    %c0_73 = arith.constant 0 : index
    %c0_74 = arith.constant 0 : index
    %c0_75 = arith.constant 0 : index
    %159 = vector.load %arg15[%c0_73, %c0_74, %c0_75] : memref<1x1x32xf32, #tpu.memory_space<vmem>>, vector<1x1x32xf32>
    %160 = vector.shape_cast %159 : vector<1x1x32xf32> to vector<1x32xf32>
    %c0_76 = arith.constant 0 : index
    %c0_77 = arith.constant 0 : index
    %c0_78 = arith.constant 0 : index
    %161 = vector.load %arg16[%c0_76, %c0_77, %c0_78] : memref<1x1x32xf32, #tpu.memory_space<vmem>>, vector<1x1x32xf32>
    %162 = vector.shape_cast %161 : vector<1x1x32xf32> to vector<1x32xf32>
    %cst_79 = arith.constant dense<0.000000e+00> : vector<16xf32>
    %163 = vector.multi_reduction <add>, %158, %cst_79 [1] : vector<16x32xf32> to vector<16xf32>
    %164 = vector.shape_cast %163 : vector<16xf32> to vector<16x1xf32>
    %cst_80 = arith.constant 3.200000e+01 : f32
    %165 = vector.broadcast %cst_80 : f32 to vector<16x1xf32>
    %166 = arith.divf %164, %165 : vector<16x1xf32>
    %167 = arith.mulf %158, %158 : vector<16x32xf32>
    %cst_81 = arith.constant dense<0.000000e+00> : vector<16xf32>
    %168 = vector.multi_reduction <add>, %167, %cst_81 [1] : vector<16x32xf32> to vector<16xf32>
    %169 = vector.shape_cast %168 : vector<16xf32> to vector<16x1xf32>
    %cst_82 = arith.constant 3.200000e+01 : f32
    %170 = vector.broadcast %cst_82 : f32 to vector<16x1xf32>
    %171 = arith.divf %169, %170 : vector<16x1xf32>
    %172 = arith.mulf %166, %166 : vector<16x1xf32>
    %173 = arith.subf %171, %172 : vector<16x1xf32>
    %174 = vector.broadcast %166 : vector<16x1xf32> to vector<16x32xf32>
    %175 = arith.subf %158, %174 : vector<16x32xf32>
    %cst_83 = arith.constant 9.99999974E-6 : f32
    %176 = vector.broadcast %cst_83 : f32 to vector<16x1xf32>
    %177 = arith.addf %173, %176 : vector<16x1xf32>
    %178 = math.rsqrt %177 : vector<16x1xf32>
    %179 = vector.broadcast %178 : vector<16x1xf32> to vector<16x32xf32>
    %180 = arith.mulf %175, %179 : vector<16x32xf32>
    %181 = vector.broadcast %160 : vector<1x32xf32> to vector<16x32xf32>
    %182 = arith.mulf %180, %181 : vector<16x32xf32>
    %183 = vector.broadcast %162 : vector<1x32xf32> to vector<16x32xf32>
    %184 = arith.addf %182, %183 : vector<16x32xf32>
    %c0_84 = arith.constant 0 : index
    %c0_85 = arith.constant 0 : index
    %185 = vector.load %arg20[%c0_84, %c0_85] : memref<16x32xf32, #tpu.memory_space<vmem>>, vector<16x32xf32>
    tpu.vector_store %arg20[%c0_84, %c0_85], %184 {strides = array<i32>} : memref<16x32xf32, #tpu.memory_space<vmem>>, vector<16x32xf32>,
    %c1_i32 = arith.constant 1 : i32
    %186 = arith.cmpi eq, %arg1, %c1_i32 : i32
    %187 = arith.extui %186 : i1 to i32
    %c0_i32_86 = arith.constant 0 : i32
    %188 = arith.cmpi ne, %187, %c0_i32_86 : i32
    scf.if %188 {
      %c0_87 = arith.constant 0 : index
      %c0_88 = arith.constant 0 : index
      %c0_89 = arith.constant 0 : index
      %189 = vector.load %arg4[%c0_87, %c0_88, %c0_89] : memref<2x8x1xf32, #tpu.memory_space<vmem>>, vector<2x8x1xf32>
      %190 = vector.shape_cast %184 : vector<16x32xf32> to vector<2x8x32xf32>
      %191 = vector.broadcast %189 : vector<2x8x1xf32> to vector<2x8x32xf32>
      %192 = arith.mulf %190, %191 : vector<2x8x32xf32>
      %cst_90 = arith.constant dense<0.000000e+00> : vector<2x32xf32>
      %193 = vector.multi_reduction <add>, %192, %cst_90 [1] : vector<2x8x32xf32> to vector<2x32xf32>
      %cst_91 = arith.constant dense<0.000000e+00> : vector<2x1xf32>
      %194 = vector.multi_reduction <add>, %189, %cst_91 [1] : vector<2x8x1xf32> to vector<2x1xf32>
      %cst_92 = arith.constant 9.99999993E-9 : f32
      %195 = vector.broadcast %cst_92 : f32 to vector<2x1xf32>
      %196 = arith.maximumf %194, %195 : vector<2x1xf32>
      %197 = vector.broadcast %196 : vector<2x1xf32> to vector<2x32xf32>
      %198 = arith.divf %193, %197 : vector<2x32xf32>
      %c0_93 = arith.constant 0 : index
      %c0_94 = arith.constant 0 : index
      %199 = vector.load %arg17[%c0_93, %c0_94] : memref<32x128xf32, #tpu.memory_space<vmem>>, vector<32x128xf32>
      %cst_95 = arith.constant dense<0.000000e+00> : vector<2x128xf32>
      %200 = tpu.matmul %198, %199, %cst_95 {dimension_numbers = #tpu.dot_dimension_numbers<[1], [0], [0], [1], [0, 0, 1, 1], [], []>} : vector<2x32xf32>, vector<32x128xf32>, vector<2x128xf32> -> vector<2x128xf32>
      %c0_96 = arith.constant 0 : index
      %c0_97 = arith.constant 0 : index
      %201 = vector.load %arg18[%c0_96, %c0_97] : memref<1x128xf32, #tpu.memory_space<vmem>>, vector<1x128xf32>
      %202 = vector.broadcast %201 : vector<1x128xf32> to vector<2x128xf32>
      %203 = arith.addf %200, %202 : vector<2x128xf32>
      %c0_98 = arith.constant 0 : index
      %c0_99 = arith.constant 0 : index
      %204 = vector.load %arg19[%c0_98, %c0_99] : memref<2x128xf32, #tpu.memory_space<vmem>>, vector<2x128xf32>
      tpu.vector_store %arg19[%c0_98, %c0_99], %203 {strides = array<i32>} : memref<2x128xf32, #tpu.memory_space<vmem>>, vector<2x128xf32>,
    } else {
    }
    return
  }
  func.func @transform_0(%arg0: i32, %arg1: i32) -> (i32, i32, i32) {
    %c0_i32 = arith.constant 0 : i32
    %c0_i32_0 = arith.constant 0 : i32
    %c0_i32_1 = arith.constant 0 : i32
    return %arg0, %c0_i32, %c0_i32_0 : i32, i32, i32
  }
  func.func @transform_1(%arg0: i32, %arg1: i32) -> (i32, i32, i32) {
    %c0_i32 = arith.constant 0 : i32
    %c0_i32_0 = arith.constant 0 : i32
    %c0_i32_1 = arith.constant 0 : i32
    return %arg0, %c0_i32, %c0_i32_0 : i32, i32, i32
  }
  func.func @transform_2(%arg0: i32, %arg1: i32) -> (i32, i32, i32) {
    %c0_i32 = arith.constant 0 : i32
    %c0_i32_0 = arith.constant 0 : i32
    %c0_i32_1 = arith.constant 0 : i32
    return %arg0, %c0_i32, %c0_i32_0 : i32, i32, i32
  }
  func.func @transform_3(%arg0: i32, %arg1: i32) -> (i32, i32, i32) {
    %c0_i32 = arith.constant 0 : i32
    %c0_i32_0 = arith.constant 0 : i32
    %c0_i32_1 = arith.constant 0 : i32
    return %arg1, %c0_i32, %c0_i32_0 : i32, i32, i32
  }
  func.func @transform_4(%arg0: i32, %arg1: i32) -> (i32, i32, i32) {
    %c0_i32 = arith.constant 0 : i32
    %c0_i32_0 = arith.constant 0 : i32
    %c0_i32_1 = arith.constant 0 : i32
    return %arg1, %c0_i32, %c0_i32_0 : i32, i32, i32
  }
  func.func @transform_5(%arg0: i32, %arg1: i32) -> (i32, i32, i32, i32) {
    %c0_i32 = arith.constant 0 : i32
    %c0_i32_0 = arith.constant 0 : i32
    %c0_i32_1 = arith.constant 0 : i32
    %c0_i32_2 = arith.constant 0 : i32
    return %arg1, %c0_i32, %c0_i32_0, %c0_i32_1 : i32, i32, i32, i32
  }
  func.func @transform_6(%arg0: i32, %arg1: i32) -> (i32, i32, i32) {
    %c0_i32 = arith.constant 0 : i32
    %c0_i32_0 = arith.constant 0 : i32
    %c0_i32_1 = arith.constant 0 : i32
    return %arg1, %c0_i32, %c0_i32_0 : i32, i32, i32
  }
  func.func @transform_7(%arg0: i32, %arg1: i32) -> (i32, i32, i32) {
    %c0_i32 = arith.constant 0 : i32
    %c0_i32_0 = arith.constant 0 : i32
    %c0_i32_1 = arith.constant 0 : i32
    return %arg1, %c0_i32, %c0_i32_0 : i32, i32, i32
  }
  func.func @transform_8(%arg0: i32, %arg1: i32) -> (i32, i32, i32) {
    %c0_i32 = arith.constant 0 : i32
    %c0_i32_0 = arith.constant 0 : i32
    %c0_i32_1 = arith.constant 0 : i32
    return %arg1, %c0_i32, %c0_i32_0 : i32, i32, i32
  }
  func.func @transform_9(%arg0: i32, %arg1: i32) -> (i32, i32, i32) {
    %c0_i32 = arith.constant 0 : i32
    %c0_i32_0 = arith.constant 0 : i32
    %c0_i32_1 = arith.constant 0 : i32
    return %arg1, %c0_i32, %c0_i32_0 : i32, i32, i32
  }
  func.func @transform_10(%arg0: i32, %arg1: i32) -> (i32, i32, i32) {
    %c0_i32 = arith.constant 0 : i32
    %c0_i32_0 = arith.constant 0 : i32
    %c0_i32_1 = arith.constant 0 : i32
    return %arg1, %c0_i32, %c0_i32_0 : i32, i32, i32
  }
  func.func @transform_11(%arg0: i32, %arg1: i32) -> (i32, i32, i32) {
    %c0_i32 = arith.constant 0 : i32
    %c0_i32_0 = arith.constant 0 : i32
    %c0_i32_1 = arith.constant 0 : i32
    return %arg1, %c0_i32, %c0_i32_0 : i32, i32, i32
  }
  func.func @transform_12(%arg0: i32, %arg1: i32) -> (i32, i32, i32) {
    %c0_i32 = arith.constant 0 : i32
    %c0_i32_0 = arith.constant 0 : i32
    %c0_i32_1 = arith.constant 0 : i32
    return %arg1, %c0_i32, %c0_i32_0 : i32, i32, i32
  }
  func.func @transform_13(%arg0: i32, %arg1: i32) -> (i32, i32, i32) {
    %c0_i32 = arith.constant 0 : i32
    %c0_i32_0 = arith.constant 0 : i32
    %c0_i32_1 = arith.constant 0 : i32
    return %arg1, %c0_i32, %c0_i32_0 : i32, i32, i32
  }
  func.func @transform_14(%arg0: i32, %arg1: i32) -> (i32, i32, i32) {
    %c0_i32 = arith.constant 0 : i32
    %c0_i32_0 = arith.constant 0 : i32
    %c0_i32_1 = arith.constant 0 : i32
    return %arg1, %c0_i32, %c0_i32_0 : i32, i32, i32
  }
  func.func @transform_15(%arg0: i32, %arg1: i32) -> (i32, i32) {
    %c0_i32 = arith.constant 0 : i32
    %c0_i32_0 = arith.constant 0 : i32
    %c0_i32_1 = arith.constant 0 : i32
    return %c0_i32, %c0_i32_0 : i32, i32
  }
  func.func @transform_16(%arg0: i32, %arg1: i32) -> (i32, i32) {
    %c0_i32 = arith.constant 0 : i32
    %c0_i32_0 = arith.constant 0 : i32
    %c0_i32_1 = arith.constant 0 : i32
    return %c0_i32, %c0_i32_0 : i32, i32
  }
  func.func @transform_17(%arg0: i32, %arg1: i32) -> (i32, i32) {
    %c0_i32 = arith.constant 0 : i32
    %c0_i32_0 = arith.constant 0 : i32
    return %arg0, %c0_i32 : i32, i32
  }
}

</mosaic_0001>

<bundles_post_ra>
// kernel: transformer_forward.1
= control target key start
LH: loop header
LB: loop body
LE: loop exit
PB: predicated region body
PF: predicated region fallthrough
CT: control target
= control target key end

     0   :  { %s5830_s0 = inlined_call_operand.hbm [shape: f32[2,8,32], index: 0, kind: input, shape index: {}]   ;;  %s5831_s1 = inlined_call_operand.hbm [shape: f32[2,1,8], index: 1, kind: input, shape index: {}]   ;;  %s5832_s2 = inlined_call_operand.hbm [shape: f32[2,8,1], index: 2, kind: input, shape index: {}]   ;;  %s5833_s3 = inlined_call_operand.hbm [shape: f32[2,32,96], index: 3, kind: input, shape index: {}]   ;;  %s5834_s4 = inlined_call_operand.hbm [shape: f32[2,1,96], index: 4, kind: input, shape index: {}]   ;;  %s5835_s5 = inlined_call_operand.hbm [shape: f32[2,4,8,32], index: 5, kind: input, shape index: {}]   ;;  %s5836_s6 = inlined_call_operand.hbm [shape: f32[2,1,32], index: 6, kind: input, shape index: {}]   ;;  %s5837_s7 = inlined_call_operand.hbm [shape: f32[2,1,32], index: 7, kind: input, shape index: {}]   ;;  %s5838_s8 = inlined_call_operand.hbm [shape: f32[2,1,32], index: 8, kind: input, shape index: {}]   ;;  %s5839_s9 = inlined_call_operand.hbm [shape: f32[2,32,64], index: 9, kind: input, shape index: {}]   ;;  %s5840_s10 = inlined_call_operand.hbm [shape: f32[2,1,64], index: 10, kind: input, shape index: {}]   ;;  %s5841_s11 = inlined_call_operand.hbm [shape: f32[2,64,32], index: 11, kind: input, shape index: {}]   ;;  %s5842_s12 = inlined_call_operand.hbm [shape: f32[2,1,32], index: 12, kind: input, shape index: {}]   ;;  %s5843_s13 = inlined_call_operand.hbm [shape: f32[2,1,32], index: 13, kind: input, shape index: {}]   ;;  %s5844_s14 = inlined_call_operand.hbm [shape: f32[2,1,32], index: 14, kind: input, shape index: {}]   ;;  %s5845_s15 = inlined_call_operand.hbm [shape: f32[32,128], index: 15, kind: input, shape index: {}]   ;;  %s5846_s16 = inlined_call_operand.hbm [shape: f32[1,128], index: 16, kind: input, shape index: {}]   ;;  %s5847_s17 = inlined_call_operand.hbm [shape: f32[2,128], index: 17, kind: output, shape index: {}]  }
   0x1   :  { %5887 = sst [smem:[#allocation47_spill]] %s5830_s0 }
   0x2   :  { %5888 = sst [smem:[#allocation48_spill]] %s5831_s1 }
   0x3   :  { %5889 = sst [smem:[#allocation49_spill]] %s5833_s3 }
   0x4   :  { %5890 = sst [smem:[#allocation50_spill]] %s5834_s4 }
   0x5   :  { %5891 = sst [smem:[#allocation51_spill]] %s5835_s5 }
   0x6   :  { %5892 = sst [smem:[#allocation52_spill]] %s5836_s6 }
   0x7   :  { %5893 = sst [smem:[#allocation53_spill]] %s5837_s7 }
   0x8   :  { %5894 = sst [smem:[#allocation54_spill]] %s5838_s8 }
   0x9   :  { %5895 = sst [smem:[#allocation55_spill]] %s5839_s9 }
   0xa   :  { %5896 = sst [smem:[#allocation56_spill]] %s5840_s10 }
   0xb   :  { %5897 = sst [smem:[#allocation57_spill]] %s5841_s11 }
   0xc   :  { %5898 = sst [smem:[#allocation58_spill]] %s5842_s12 }
   0xd   :  { %5899 = sst [smem:[#allocation59_spill]] %s5843_s13 }
   0xe   :  { %5900 = sst [smem:[#allocation60_spill]] %s5844_s14 }
   0xf   :  { %5901 = sst [smem:[#allocation61_spill]] %s5845_s15 }
  0x10   :  { %5902 = sst [smem:[#allocation62_spill]] %s5846_s16 }
  0x11   :  { %5903 = sst [smem:[#allocation63_spill]] %s5847_s17 }
  0x12   :  { %22 = vsyncpa [#allocation4], 0 }
  0x13   :  { %23 = vsyncpa [#allocation7], 0 }
  0x14   :  { %24 = vsyncpa [#allocation10], 0 }
  0x15   :  { %26 = vsyncpa [#allocation10 + $0x1], 0 }
  0x16   :  { %27 = vsyncpa [#allocation13], 0 }
  0x17   :  { %29 = vsyncpa [#allocation13 + $0x1], 0 }
  0x18   :  { %30 = vsyncpa [#allocation16], 0 }
  0x19   :  { %32 = vsyncpa [#allocation16 + $0x1], 0 }
  0x1a   :  { %33 = vsyncpa [#allocation19], 0 }
  0x1b   :  { %35 = vsyncpa [#allocation19 + $0x1], 0 }
  0x1c   :  { %36 = vsyncpa [#allocation22], 0 }
  0x1d   :  { %38 = vsyncpa [#allocation22 + $0x1], 0 }
  0x1e   :  { %39 = vsyncpa [#allocation25], 0 }
  0x1f   :  { %41 = vsyncpa [#allocation25 + $0x1], 0 }
  0x20   :  { %42 = vsyncpa [#allocation28], 0 }
  0x21   :  { %43 = vsyncpa [#allocation5], 0  ;;  %s4953_s24 = smov 0   ;;  %s4955_s25 = smov 0  }
  0x22   :  { %s4957_s26 = smov 0   ;;  %s4959_s27 = smov 0  }
  0x23   :  { %s4961_s28 = smov 0   ;;  %s4963_s29 = smov 0  }
  0x24 LB: > { %5904 = sst [smem:[#allocation41_spill]] %s4806_s25  ;;  %s4982_s0 = sadd.s32 4294967295, %s4822_s29   ;;  %s4822_s29 = sphi %s4963_s29, %s49_s29   ;;  %s4818_s28 = sphi %s4961_s28, %s5976_s28   ;;  %s4814_s27 = sphi %s4959_s27, %s5975_s27   ;;  %s4810_s26 = sphi %s4957_s26, %s5974_s26   ;;  %s4806_s25 = sphi %s4955_s25, %s5973_s25   ;;  %s4802_s24 = sphi %s4953_s24, %s5971_s24  }
  0x25   : > { %5905 = sst [smem:[#allocation42_spill]] %s4814_s27  ;;  %p153_p0 = scmp.ne.s32.totalorder %s4810_s26, %s4806_s25 }
  0x26   : > { %5906 = sst [smem:[#allocation43_spill]] %s4982_s0  ;;  %p154_p1 = scmp.eq.s32.totalorder %s4822_s29, 0 }
  0x27   : > { %p159_p2 = scmp.ne.s32.totalorder %s4806_s25, %s4802_s24  ;;  %p5858_p3 = scmp.eq.s32.totalorder %s4982_s0, 0 }
  0x28   : > { %p3608_p4 = scmp.ge.s32.totalorder %s4822_s29, 1  ;;  %p155_p5 = por %p154_p1, %p153_p0 }
  0x29   : > { %p524_p6 = scmp.lt.s32.totalorder %s4822_s29, 3  ;;  %p4993_p7 = por %p5858_p3, %p159_p2 }
  0x2a   : > { %s4824_s19 = smov [#allocation6]   ;;  %p4081_p11 = scmp.lt.s32.totalorder %s4822_s29, 2 }
  0x2b   : > { %s5907_s30 = scalar_select %p4993_p7, 1, 0 }
  0x2c   : > { %p4997_p8 = pnand %p3608_p4, %p524_p6  ;;  %s555_s1 = sshll.u32 %s4824_s19, 4  ;;  %s556_s1 = int_to_ptr.vmem [resolvable:$true] %s555_s1 }
  0x2d   : > { %5908 = sst [smem:[#allocation44_spill]] %s5907_s30  ;;  %s5011_s21 = sand.u32 1, %s4810_s26  }
  0x2e   : > { %s5909_s18 = scalar_select %p4997_p8, 1, 0 }
  0x2f   : > { %p4023_p9 = pneg %p4997_p8  ;;  %p5013_p12 = pnand %p4081_p11, %p155_p5 }
  0x30   : > { %5910 = sst [smem:[#allocation45_spill]] %s5909_s18  ;;  %s5913_s17 = sld [smem:[#allocation48_spill]] }
  0x31   : > { %p5005_p10 = pnand %p4023_p9, %p5858_p3 }
  0x32   : > { %s5912_s22 = scalar_select %p5013_p12, 1, 0 }
  0x33   : > { %s5911_s20 = scalar_select %p5005_p10, 1, 0 }
  0x34   : > { %p5025_p0 = pneg %p5005_p10 }
  0x36   : > { %s4210_s19 = scalar_lea.hbm %s5913_s17, 32 }
  0x37   : > { %p4211_p13 = scmp.ne.s32.totalorder %s5913_s17, %s4210_s19  ;;  %p4217_p4 = scmp.lt.u32.totalorder %s4210_s19, %s5913_s17 }
  0x38   : > { %s5914_s25 = scalar_select %p5025_p0, 1, 0 }
  0x39   : > { %p4213_p1 = pnand %p5025_p0, %p4211_p13 }
  0x3b   : > { %p4214_p2 = pneg %p4213_p1 }
  0x3d   : > { %p4219_p5 = pnand %p4217_p4, %p4214_p2 }
  0x3f   : > { %4222 = shalt.err (!%p4219_p5)
}
  0x40   : > { %s4223_s23 = scalar_lea.vmem %s556_s1, 32  ;;  %p4231_p3 = scmp.lt.s32.totalorder %s556_s1, %s556_s1 }
  0x41   : > { %p4224_p6 = scmp.ne.s32.totalorder %s556_s1, %s4223_s23  ;;  %p4232_p7 = scmp.lt.s32.totalorder %s4223_s23, %s4223_s23 }
  0x43   : > { %p4226_p9 = pnand %p4224_p6, %p5025_p0  ;;  %p4233_p8 = por %p4232_p7, %p4231_p3 }
  0x45   : > { %p4227_p11 = pneg %p4226_p9 }
  0x47   : > { %p4234_p12 = pnand %p4233_p8, %p4227_p11 }
  0x49   : > { %4237 = shalt.err (!%p4234_p12)
}
  0x4a   : > { %s4825_s27 = smov 16   ;;  %s4826_s30 = smov 1  }
  0x4b   : > { %4029 = dma.hbm_to_vmem [thread:$0]  (!%p5005_p10), %s5913_s17, 32, %s556_s1, [#allocation7], %s4825_s27, %s4825_s27, %s4826_s30  }
  0x4c   : > { %s4827_s24 = smov [#allocation27]   ;;  %s58_s14 = sadd.s32 1, %s4818_s28 }
  0x4d   : > { %s584_s19 = sshll.u32 %s4827_s24, 4  ;;  %s5915_s15 = sld [smem:[#allocation61_spill]]  ;;  %s585_s19 = int_to_ptr.vmem [resolvable:$true] %s584_s19 }
  0x53   : > { %s4238_s23 = scalar_lea.hbm %s5915_s15, 512 }
  0x54   : > { %p4239_p3 = scmp.ne.s32.totalorder %s5915_s15, %s4238_s23  ;;  %p4245_p12 = scmp.lt.u32.totalorder %s4238_s23, %s5915_s15 }
  0x56   : > { %p4241_p7 = pnand %p4239_p3, %p5025_p0 }
  0x58   : > { %p4242_p8 = pneg %p4241_p7 }
  0x5a   : > { %p4247_p13 = pnand %p4245_p12, %p4242_p8 }
  0x5c   : > { %4250 = shalt.err (!%p4247_p13)
}
  0x5d   : > { %s4251_s1 = scalar_lea.vmem %s585_s19, 512  ;;  %p4259_p5 = scmp.lt.s32.totalorder %s585_s19, %s585_s19 }
  0x5e   : > { %p4252_p1 = scmp.ne.s32.totalorder %s585_s19, %s4251_s1  ;;  %p4260_p6 = scmp.lt.s32.totalorder %s4251_s1, %s4251_s1 }
  0x60   : > { %p4254_p2 = pnand %p4252_p1, %p5025_p0  ;;  %p4261_p9 = por %p4260_p6, %p4259_p5 }
  0x62   : > { %p4255_p4 = pneg %p4254_p2 }
  0x64   : > { %p4262_p11 = pnand %p4261_p9, %p4255_p4 }
  0x66   : > { %4265 = shalt.err (!%p4262_p11)
}
  0x67   : > { %s5869_s6 = smov 128   ;;  %s5871_s4 = smov 8  }
  0x68   : > { %4035 = dma.hbm_to_vmem [thread:$0]  (!%p5005_p10), %s5915_s15, 512, %s585_s19, [#allocation28], %s5869_s6, %s5869_s6, %s5871_s4  }
  0x69   : > { %p59_p3 = scmp.ge.s32.totalorder %s58_s14, 2  ;;  %s146_s12 = sadd.s32 1, %s4810_s26 }
  0x6a   : > { %s5065_s16 = sand.u32 1, %s4822_s29   ;;  %s5068_s27 = sshll.u32 %s5011_s21, 5 }
  0x6b   : > { %s5978_s14 = smov (%p59_p3, %s58_s14), 0  ;;  %s5075_s0 = sshll.u32 %s4818_s28, 9 }
  0x6c   : > { %5916 = sst [smem:[#allocation46_spill]] %s5978_s14  ;;  %s143_s30 = ssub.s32 %s4818_s28, %s5978_s14 }
  0x6d   : > { %p144_p7 = scmp.eq.s32.totalorder %s143_s30, 0  ;;  %s5917_s3 = sld [smem:[#allocation49_spill]] }
  0x6e   : > { %s613_s23 = scalar_lea.vmem [#allocation9], %s5068_s27  ;;  %p5918_p12 = scmp.ne.s32.totalorder %s5912_s22, 0 }
  0x6f   : > { %s620_s1 = sshll.u32 %s613_s23, 4  ;;  %s5087_s1 = int_to_ptr.vmem [resolvable:$true] %s620_s1 }
  0x70   : > { %s5085_s8 = scalar_select %p144_p7, %s4810_s26, %s146_s12  }
  0x71   : > { %p5094_p13 = pneg %p5918_p12 }
  0x73   : > { %s5081_s19 = scalar_lea.hbm %s5917_s3, %s5075_s0  ;;  %s4271_s23 = scalar_lea.hbm %s5917_s3, 1024 }
  0x74   : > { %s4266_s6 = scalar_lea.hbm %s5081_s19, 512  ;;  %p4272_p4 = scmp.lt.u32.totalorder %s5081_s19, %s5917_s3 }
  0x75   : > { %p4267_p8 = scmp.ne.s32.totalorder %s5081_s19, %s4266_s6  ;;  %p4273_p5 = scmp.lt.u32.totalorder %s4271_s23, %s4266_s6 }
  0x76   : > { %s5919_s30 = scalar_select %p5094_p13, 1, 0 }
  0x77   : > { %p4269_p1 = pnand %p5094_p13, %p4267_p8  ;;  %p4274_p6 = por %p4273_p5, %p4272_p4 }
  0x78   : > { %p4275_p9 = scmp.lt.u32.totalorder %s4266_s6, %s5081_s19 }
  0x79   : > { %p4270_p2 = pneg %p4269_p1 }
  0x7a   : > { %p4276_p11 = por %p4275_p9, %p4274_p6 }
  0x7c   : > { %p4277_p3 = pnand %p4276_p11, %p4270_p2 }
  0x7e   : > { %4280 = shalt.err (!%p4277_p3)
}
  0x7f   : > { %s4281_s10 = scalar_lea.vmem %s5087_s1, 512  ;;  %s4830_s18 = smov [#allocation9]  }
  0x80   : > { %p4282_p7 = scmp.ne.s32.totalorder %s5087_s1, %s4281_s10  ;;  %s4286_s24 = sshll.u32 %s4830_s18, 4  ;;  %s4287_s24 = int_to_ptr.vmem [resolvable:$false] %s4286_s24 }
  0x81   : > { %s4288_s4 = scalar_lea.vmem %s4287_s24, 1024  ;;  %p4289_p10 = scmp.lt.s32.totalorder %s5087_s1, %s4287_s24 }
  0x82   : > { %p4284_p8 = pnand %p4282_p7, %p5094_p13  ;;  %p4290_p0 = scmp.lt.s32.totalorder %s4288_s4, %s4281_s10 }
  0x84   : > { %p4285_p1 = pneg %p4284_p8  ;;  %p4291_p4 = por %p4290_p0, %p4289_p10 }
  0x86   : > { %p4292_p5 = pnand %p4291_p4, %p4285_p1 }
  0x88   : > { %4295 = shalt.err (!%p4292_p5)
}
  0x89   : > { %s5920_s6 = smov 8   ;;  %s5921_s23 = smov 128  }
  0x8a   : > { %s5922_s12 = scalar_lea.sflag [#allocation10], %s5065_s16  ;;  %s5923_s5 = sld [smem:[#allocation51_spill]] }
  0x8b   : > { %4042 = dma.hbm_to_vmem [thread:$0]  (!%p5918_p12), %s5081_s19, 512, %s5087_s1, %s5922_s12, %s5921_s23, %s5921_s23, %s5920_s6  }
  0x8c   : > { %s651_s4 = scalar_lea.vmem [#allocation12], %s5068_s27  ;;  %s5132_s15 = sshll.u32 %s4818_s28, 4 }
  0x8d   : > { %s658_s3 = sshll.u32 %s651_s4, 4  ;;  %s5879_s17 = scalar_lea.sflag [#allocation13], %s5065_s16  ;;  %s5129_s3 = int_to_ptr.vmem [resolvable:$true] %s658_s3 }
  0x90   : > { %s5126_s24 = scalar_lea.hbm %s5923_s5, %s5075_s0  ;;  %s4301_s12 = scalar_lea.hbm %s5923_s5, 1024 }
  0x91   : > { %s4296_s14 = scalar_lea.hbm %s5126_s24, 512  ;;  %p4302_p6 = scmp.lt.u32.totalorder %s5126_s24, %s5923_s5 }
  0x92   : > { %p4297_p10 = scmp.ne.s32.totalorder %s5126_s24, %s4296_s14  ;;  %p4303_p9 = scmp.lt.u32.totalorder %s4301_s12, %s4296_s14 }
  0x93   : > { %p4305_p3 = scmp.lt.u32.totalorder %s4296_s14, %s5126_s24 }
  0x94   : > { %p4299_p0 = pnand %p4297_p10, %p5094_p13  ;;  %p4304_p11 = por %p4303_p9, %p4302_p6 }
  0x96   : > { %p4300_p2 = pneg %p4299_p0  ;;  %p4306_p7 = por %p4305_p3, %p4304_p11 }
  0x98   : > { %p4307_p8 = pnand %p4306_p7, %p4300_p2 }
  0x9a   : > { %4310 = shalt.err (!%p4307_p8)
}
  0x9b   : > { %s4311_s4 = scalar_lea.vmem %s5129_s3, 512  ;;  %s4831_s19 = smov [#allocation12]  }
  0x9c   : > { %p4312_p1 = scmp.ne.s32.totalorder %s5129_s3, %s4311_s4  ;;  %s4316_s1 = sshll.u32 %s4831_s19, 4  ;;  %s4317_s1 = int_to_ptr.vmem [resolvable:$false] %s4316_s1 }
  0x9d   : > { %s4318_s18 = scalar_lea.vmem %s4317_s1, 1024  ;;  %p4319_p10 = scmp.lt.s32.totalorder %s5129_s3, %s4317_s1 }
  0x9e   : > { %p4314_p4 = pnand %p4312_p1, %p5094_p13  ;;  %p4320_p0 = scmp.lt.s32.totalorder %s4318_s18, %s4311_s4 }
  0xa0   : > { %p4315_p5 = pneg %p4314_p4  ;;  %p4321_p6 = por %p4320_p0, %p4319_p10 }
  0xa2   : > { %p4322_p9 = pnand %p4321_p6, %p4315_p5 }
  0xa4   : > { %4325 = shalt.err (!%p4322_p9)
}
  0xa5   : > { %4048 = dma.hbm_to_vmem [thread:$0]  (!%p5918_p12), %s5126_s24, 512, %s5129_s3, %s5879_s17, %s5921_s23, %s5921_s23, %s5920_s6  }
  0xa6   : > { %s5924_s7 = sld [smem:[#allocation53_spill]]  ;;  %s688_s4 = scalar_lea.vmem [#allocation15], %s5011_s21 }
  0xa7   : > { %s695_s19 = sshll.u32 %s688_s4, 4  ;;  %s696_s19 = int_to_ptr.vmem [resolvable:$true] %s695_s19 }
  0xac   : > { %s5165_s10 = scalar_lea.hbm %s5924_s7, %s5132_s15  ;;  %s4331_s24 = scalar_lea.hbm %s5924_s7, 32 }
  0xad   : > { %s4326_s18 = scalar_lea.hbm %s5165_s10, 16  ;;  %p4332_p7 = scmp.lt.u32.totalorder %s5165_s10, %s5924_s7 }
  0xae   : > { %p4327_p2 = scmp.ne.s32.totalorder %s5165_s10, %s4326_s18  ;;  %p4333_p8 = scmp.lt.u32.totalorder %s4331_s24, %s4326_s18 }
  0xaf   : > { %p4335_p4 = scmp.lt.u32.totalorder %s4326_s18, %s5165_s10 }
  0xb0   : > { %p4329_p11 = pnand %p4327_p2, %p5094_p13  ;;  %p4334_p1 = por %p4333_p8, %p4332_p7 }
  0xb2   : > { %p4330_p3 = pneg %p4329_p11  ;;  %p4336_p5 = por %p4335_p4, %p4334_p1 }
  0xb4   : > { %p4337_p10 = pnand %p4336_p5, %p4330_p3 }
  0xb6   : > { %4340 = shalt.err (!%p4337_p10)
}
  0xb7   : > { %s4341_s4 = scalar_lea.vmem %s696_s19, 16  ;;  %s4832_s17 = smov [#allocation15]  }
  0xb8   : > { %p4342_p0 = scmp.ne.s32.totalorder %s696_s19, %s4341_s4  ;;  %s4346_s1 = sshll.u32 %s4832_s17, 4  ;;  %s4347_s1 = int_to_ptr.vmem [resolvable:$false] %s4346_s1 }
  0xb9   : > { %s4348_s5 = scalar_lea.vmem %s4347_s1, 32  ;;  %p4349_p2 = scmp.lt.s32.totalorder %s696_s19, %s4347_s1 }
  0xba   : > { %p4344_p6 = pnand %p4342_p0, %p5094_p13  ;;  %p4350_p11 = scmp.lt.s32.totalorder %s4348_s5, %s4341_s4 }
  0xbc   : > { %p4345_p9 = pneg %p4344_p6  ;;  %p4351_p12 = por %p4350_p11, %p4349_p2 }
  0xbe   : > { %p4352_p7 = pnand %p4351_p12, %p4345_p9 }
  0xc0   : > { %4355 = shalt.err (!%p4352_p7)
}
  0xc1   : > { %p5925_p8 = scmp.ne.s32.totalorder %s5912_s22, 0  ;;  %s5926_s18 = scalar_lea.sflag [#allocation16], %s5065_s16 }
  0xc2   : > { %s5927_s9 = sld [smem:[#allocation55_spill]]  ;;  %s723_s1 = scalar_lea.vmem [#allocation18], %s5068_s27 }
  0xc3   : > { %4054 = dma.hbm_to_vmem [thread:$0]  (!%p5925_p8), %s5165_s10, 16, %s696_s19, %s5926_s18  }
  0xc4   : > { %s730_s14 = sshll.u32 %s723_s1, 4  ;;  %s3629_s12 = sshll.u32 %s5011_s21, 6  ;;  %s5195_s14 = int_to_ptr.vmem [resolvable:$true] %s730_s14 }
  0xc5   : > { %s5883_s4 = scalar_lea.sflag [#allocation19], %s5065_s16 }
  0xc8   : > { %s5192_s24 = scalar_lea.hbm %s5927_s9, %s5075_s0  ;;  %s4361_s0 = scalar_lea.hbm %s5927_s9, 1024 }
  0xc9   : > { %s4356_s5 = scalar_lea.hbm %s5192_s24, 512  ;;  %p4362_p4 = scmp.lt.u32.totalorder %s5192_s24, %s5927_s9 }
  0xca   : > { %p4357_p12 = scmp.ne.s32.totalorder %s5192_s24, %s4356_s5  ;;  %p4363_p5 = scmp.lt.u32.totalorder %s4361_s0, %s4356_s5 }
  0xcb   : > { %p4365_p0 = scmp.lt.u32.totalorder %s4356_s5, %s5192_s24 }
  0xcc   : > { %p4359_p3 = pnand %p4357_p12, %p5094_p13  ;;  %p4364_p10 = por %p4363_p5, %p4362_p4 }
  0xce   : > { %p4360_p1 = pneg %p4359_p3  ;;  %p4366_p6 = por %p4365_p0, %p4364_p10 }
  0xd0   : > { %p4367_p9 = pnand %p4366_p6, %p4360_p1 }
  0xd2   : > { %4370 = shalt.err (!%p4367_p9)
}
  0xd3   : > { %s4371_s27 = scalar_lea.vmem %s5195_s14, 512  ;;  %s4833_s17 = smov [#allocation18]  }
  0xd4   : > { %p4372_p2 = scmp.ne.s32.totalorder %s5195_s14, %s4371_s27  ;;  %s4376_s1 = sshll.u32 %s4833_s17, 4  ;;  %s4377_s1 = int_to_ptr.vmem [resolvable:$false] %s4376_s1 }
  0xd5   : > { %s4378_s10 = scalar_lea.vmem %s4377_s1, 1024  ;;  %p4379_p12 = scmp.lt.s32.totalorder %s5195_s14, %s4377_s1 }
  0xd6   : > { %p4374_p11 = pnand %p4372_p2, %p5094_p13  ;;  %p4380_p3 = scmp.lt.s32.totalorder %s4378_s10, %s4371_s27 }
  0xd8   : > { %p4375_p7 = pneg %p4374_p11  ;;  %p4381_p4 = por %p4380_p3, %p4379_p12 }
  0xda   : > { %p4382_p5 = pnand %p4381_p4, %p4375_p7 }
  0xdc   : > { %4385 = shalt.err (!%p4382_p5)
}
  0xdd   : > { %4060 = dma.hbm_to_vmem [thread:$0]  (!%p5925_p8), %s5192_s24, 512, %s5195_s14, %s5883_s4, %s5921_s23, %s5921_s23, %s5920_s6  }
  0xde   : > { %s3707_s5 = sshll.u32 %s4818_s28, 10  ;;  %s5928_s11 = sld [smem:[#allocation57_spill]] }
  0xdf   : > { %s761_s3 = scalar_lea.vmem [#allocation21], %s3629_s12  ;;  %s5881_s17 = scalar_lea.sflag [#allocation22], %s5065_s16 }
  0xe0   : > { %s768_s27 = sshll.u32 %s761_s3, 4  ;;  %s5233_s27 = int_to_ptr.vmem [resolvable:$true] %s768_s27 }
  0xe4   : > { %s5229_s18 = scalar_lea.hbm %s5928_s11, %s3707_s5  ;;  %s4391_s10 = scalar_lea.hbm %s5928_s11, 2048 }
  0xe5   : > { %s4386_s1 = scalar_lea.hbm %s5229_s18, 1024  ;;  %p4392_p6 = scmp.lt.u32.totalorder %s5229_s18, %s5928_s11 }
  0xe6   : > { %p4387_p1 = scmp.ne.s32.totalorder %s5229_s18, %s4386_s1  ;;  %p4393_p9 = scmp.lt.u32.totalorder %s4391_s10, %s4386_s1 }
  0xe7   : > { %p4395_p11 = scmp.lt.u32.totalorder %s4386_s1, %s5229_s18 }
  0xe8   : > { %p4389_p10 = pnand %p4387_p1, %p5094_p13  ;;  %p4394_p2 = por %p4393_p9, %p4392_p6 }
  0xea   : > { %p4390_p0 = pneg %p4389_p10  ;;  %p4396_p7 = por %p4395_p11, %p4394_p2 }
  0xec   : > { %p4397_p12 = pnand %p4396_p7, %p4390_p0 }
  0xee   : > { %4400 = shalt.err (!%p4397_p12)
}
  0xef   : > { %s4401_s12 = scalar_lea.vmem %s5233_s27, 1024  ;;  %s4834_s0 = smov [#allocation21]  }
  0xf0   : > { %p4402_p3 = scmp.ne.s32.totalorder %s5233_s27, %s4401_s12  ;;  %s4406_s3 = sshll.u32 %s4834_s0, 4  ;;  %s4407_s3 = int_to_ptr.vmem [resolvable:$false] %s4406_s3 }
  0xf1   : > { %s4408_s24 = scalar_lea.vmem %s4407_s3, 2048  ;;  %p4409_p1 = scmp.lt.s32.totalorder %s5233_s27, %s4407_s3 }
  0xf2   : > { %p4404_p4 = pnand %p4402_p3, %p5094_p13  ;;  %p4410_p10 = scmp.lt.s32.totalorder %s4408_s24, %s4401_s12 }
  0xf4   : > { %p4405_p5 = pneg %p4404_p4  ;;  %p4411_p6 = por %p4410_p10, %p4409_p1 }
  0xf6   : > { %p4412_p9 = pnand %p4411_p6, %p4405_p5 }
  0xf8   : > { %4415 = shalt.err (!%p4412_p9)
}
  0xf9   : > { %4066 = dma.hbm_to_vmem [thread:$0]  (!%p5925_p8), %s5229_s18, 1024, %s5233_s27, %s5881_s17, %s5921_s23, %s5921_s23, %s5920_s6  }
  0xfa   : > { %s5929_s13 = sld [smem:[#allocation59_spill]]  ;;  %s798_s5 = scalar_lea.vmem [#allocation24], %s5011_s21 }
  0xfb   : > { %s805_s19 = sshll.u32 %s798_s5, 4  ;;  %s5884_s12 = scalar_lea.sflag [#allocation25], %s5065_s16  ;;  %s806_s19 = int_to_ptr.vmem [resolvable:$true] %s805_s19 }
 0x100   : > { %s5266_s10 = scalar_lea.hbm %s5929_s13, %s5132_s15  ;;  %s4421_s27 = scalar_lea.hbm %s5929_s13, 32 }
 0x101   : > { %s4416_s0 = scalar_lea.hbm %s5266_s10, 16  ;;  %p4422_p7 = scmp.lt.u32.totalorder %s5266_s10, %s5929_s13 }
 0x102   : > { %p4417_p0 = scmp.ne.s32.totalorder %s5266_s10, %s4416_s0  ;;  %p4423_p12 = scmp.lt.u32.totalorder %s4421_s27, %s4416_s0 }
 0x103   : > { %p4425_p4 = scmp.lt.u32.totalorder %s4416_s0, %s5266_s10 }
 0x104   : > { %p4419_p2 = pnand %p4417_p0, %p5094_p13  ;;  %p4424_p3 = por %p4423_p12, %p4422_p7 }
 0x106   : > { %p4420_p11 = pneg %p4419_p2  ;;  %p4426_p5 = por %p4425_p4, %p4424_p3 }
 0x108   : > { %p4427_p1 = pnand %p4426_p5, %p4420_p11 }
 0x10a   : > { %4430 = shalt.err (!%p4427_p1)
}
 0x10b   : > { %s4431_s14 = scalar_lea.vmem %s806_s19, 16  ;;  %s4835_s5 = smov [#allocation24]  }
 0x10c   : > { %p4432_p10 = scmp.ne.s32.totalorder %s806_s19, %s4431_s14  ;;  %s4436_s17 = sshll.u32 %s4835_s5, 4  ;;  %s4437_s17 = int_to_ptr.vmem [resolvable:$false] %s4436_s17 }
 0x10d   : > { %s4438_s3 = scalar_lea.vmem %s4437_s17, 32  ;;  %p4439_p0 = scmp.lt.s32.totalorder %s806_s19, %s4437_s17 }
 0x10e   : > { %p4434_p6 = pnand %p4432_p10, %p5094_p13  ;;  %p4440_p2 = scmp.lt.s32.totalorder %s4438_s3, %s4431_s14 }
 0x110   : > { %p4435_p9 = pneg %p4434_p6  ;;  %p4441_p8 = por %p4440_p2, %p4439_p0 }
 0x112   : > { %p4442_p7 = pnand %p4441_p8, %p4435_p9 }
 0x114   : > { %4445 = shalt.err (!%p4442_p7)
}
 0x115   : > { %p5930_p12 = scmp.ne.s32.totalorder %s5912_s22, 0  ;;  %s4836_s0 = smov [#allocation3]  }
 0x116   : > { %s539_s18 = sshll.u32 %s4836_s0, 4  ;;  %s4837_s27 = smov [#allocation8]   ;;  %s540_s18 = int_to_ptr.vmem [resolvable:$true] %s539_s18 }
 0x117   : > { %4072 = dma.hbm_to_vmem [thread:$0]  (!%p5930_p12), %s5266_s10, 16, %s806_s19, %s5884_s12  }
 0x118   : > { %s571_s24 = sshll.u32 %s4837_s27, 4  ;;  %s5931_s14 = sld [smem:[#allocation47_spill]]  ;;  %s5289_s24 = int_to_ptr.vmem [resolvable:$true] %s571_s24 }
 0x119   : > { %p5932_p11 = scmp.ne.s32.totalorder %s5914_s25, 0 }
 0x11e   : > { %s4446_s5 = scalar_lea.hbm %s5931_s14, 256 }
 0x11f   : > { %p4447_p8 = scmp.ne.s32.totalorder %s5931_s14, %s4446_s5  ;;  %p4453_p5 = scmp.lt.u32.totalorder %s4446_s5, %s5931_s14 }
 0x121   : > { %p4449_p3 = pnand %p4447_p8, %p5932_p11 }
 0x123   : > { %p4450_p4 = pneg %p4449_p3 }
 0x125   : > { %p4455_p1 = pnand %p4453_p5, %p4450_p4 }
 0x127   : > { %4458 = shalt.err (!%p4455_p1)
}
 0x128   : > { %s4459_s19 = scalar_lea.vmem %s540_s18, 256  ;;  %p4467_p0 = scmp.lt.s32.totalorder %s540_s18, %s540_s18 }
 0x129   : > { %p4460_p10 = scmp.ne.s32.totalorder %s540_s18, %s4459_s19  ;;  %p4468_p2 = scmp.lt.s32.totalorder %s4459_s19, %s4459_s19 }
 0x12b   : > { %p4462_p6 = pnand %p4460_p10, %p5932_p11  ;;  %p4469_p7 = por %p4468_p2, %p4467_p0 }
 0x12d   : > { %p4463_p9 = pneg %p4462_p6 }
 0x12f   : > { %p4470_p12 = pnand %p4469_p7, %p4463_p9 }
 0x131   : > { %4473 = shalt.err (!%p4470_p12)
}
 0x132   : > { %p5933_p8 = scmp.ne.s32.totalorder %s5911_s20, 0  ;;  %s4474_s1 = scalar_lea.hbm %s5832_s2, 256 }
 0x133   : > { %p4475_p3 = scmp.ne.s32.totalorder %s5832_s2, %s4474_s1  ;;  %p4481_p5 = scmp.lt.u32.totalorder %s4474_s1, %s5832_s2 }
 0x134   : > { %4026 = dma.hbm_to_vmem [thread:$0]  (!%p5933_p8), %s5931_s14, 256, %s540_s18, [#allocation4], %s5921_s23, %s5921_s23, %s5920_s6  }
 0x135   : > { %p4477_p12 = pnand %p4475_p3, %p5932_p11 }
 0x137   : > { %p4478_p4 = pneg %p4477_p12 }
 0x139   : > { %p4483_p1 = pnand %p4481_p5, %p4478_p4 }
 0x13b   : > { %4486 = shalt.err (!%p4483_p1)
}
 0x13c   : > { %s4487_s18 = scalar_lea.vmem %s5289_s24, 256  ;;  %p4495_p0 = scmp.lt.s32.totalorder %s5289_s24, %s5289_s24 }
 0x13d   : > { %p4488_p10 = scmp.ne.s32.totalorder %s5289_s24, %s4487_s18  ;;  %p4496_p2 = scmp.lt.s32.totalorder %s4487_s18, %s4487_s18 }
 0x13f   : > { %p4490_p6 = pnand %p4488_p10, %p5932_p11  ;;  %p4497_p7 = por %p4496_p2, %p4495_p0 }
 0x141   : > { %p4491_p9 = pneg %p4490_p6 }
 0x143   : > { %p4498_p3 = pnand %p4497_p7, %p4491_p9 }
 0x145   : > { %4501 = shalt.err (!%p4498_p3)
}
 0x146   : > { %4032 = dma.hbm_to_vmem [thread:$0]  (!%p5933_p8), %s5832_s2, 256, %s5289_s24, [#allocation7], %s5921_s23, %s5921_s23, %s5920_s6  }
 0x147   : > { %s4838_s4 = smov [#allocation29]   ;;  %s5934_s17 = sld [smem:[#allocation50_spill]] }
 0x148   : > { %s598_s0 = sshll.u32 %s4838_s4, 4  ;;  %s633_s3 = scalar_lea.vmem [#allocation11], %s5011_s21  ;;  %s599_s0 = int_to_ptr.vmem [resolvable:$true] %s598_s0 }
 0x149   : > { %s640_s10 = sshll.u32 %s633_s3, 4  ;;  %s5935_s9 = sld [smem:[#allocation62_spill]]  ;;  %s641_s10 = int_to_ptr.vmem [resolvable:$true] %s640_s10 }
 0x14d   : > { %s5342_s5 = scalar_lea.hbm %s5934_s17, %s5132_s15 }
 0x14f   : > { %s4502_s11 = scalar_lea.hbm %s5935_s9, 16 }
 0x150   : > { %p4503_p12 = scmp.ne.s32.totalorder %s5935_s9, %s4502_s11  ;;  %p4509_p1 = scmp.lt.u32.totalorder %s4502_s11, %s5935_s9 }
 0x152   : > { %p4505_p4 = pnand %p4503_p12, %p5932_p11 }
 0x154   : > { %p4506_p5 = pneg %p4505_p4 }
 0x156   : > { %p4511_p10 = pnand %p4509_p1, %p4506_p5 }
 0x158   : > { %4514 = shalt.err (!%p4511_p10)
}
 0x159   : > { %s4515_s24 = scalar_lea.vmem %s599_s0, 16  ;;  %s4522_s12 = scalar_lea.vmem %s599_s0, 32 }
 0x15a   : > { %p4516_p6 = scmp.ne.s32.totalorder %s599_s0, %s4515_s24  ;;  %p4523_p2 = scmp.lt.s32.totalorder %s599_s0, %s599_s0 }
 0x15b   : > { %p4524_p7 = scmp.lt.s32.totalorder %s4522_s12, %s4515_s24 }
 0x15c   : > { %p4518_p9 = pnand %p4516_p6, %p5932_p11 }
 0x15d   : > { %p4525_p3 = por %p4524_p7, %p4523_p2 }
 0x15e   : > { %p4519_p0 = pneg %p4518_p9 }
 0x160   : > { %p4526_p13 = pnand %p4525_p3, %p4519_p0 }
 0x162   : > { %4529 = shalt.err (!%p4526_p13)
}
 0x163   : > { %4038 = dma.hbm_to_vmem [thread:$0]  (!%p5933_p8), %s5935_s9, 16, %s599_s0, [#allocation28]  }
 0x164   : > { %s4530_s11 = scalar_lea.hbm %s5342_s5, 16  ;;  %p5936_p12 = scmp.ne.s32.totalorder %s5919_s30, 0 }
 0x165   : > { %p4531_p11 = scmp.ne.s32.totalorder %s5342_s5, %s4530_s11  ;;  %s4535_s27 = scalar_lea.hbm %s5934_s17, 32 }
 0x166   : > { %p4536_p13 = scmp.lt.u32.totalorder %s5342_s5, %s5934_s17  ;;  %p4537_p1 = scmp.lt.u32.totalorder %s4535_s27, %s4530_s11 }
 0x167   : > { %p4533_p4 = pnand %p4531_p11, %p5936_p12  ;;  %p4539_p6 = scmp.lt.u32.totalorder %s4530_s11, %s5342_s5 }
 0x168   : > { %p4538_p10 = por %p4537_p1, %p4536_p13 }
 0x169   : > { %p4534_p5 = pneg %p4533_p4 }
 0x16a   : > { %p4540_p9 = por %p4539_p6, %p4538_p10 }
 0x16c   : > { %p4541_p0 = pnand %p4540_p9, %p4534_p5 }
 0x16e   : > { %4544 = shalt.err (!%p4541_p0)
}
 0x16f   : > { %s4545_s0 = scalar_lea.vmem %s641_s10, 16  ;;  %s4839_s3 = smov [#allocation11]  }
 0x170   : > { %p4546_p8 = scmp.ne.s32.totalorder %s641_s10, %s4545_s0  ;;  %s4550_s18 = sshll.u32 %s4839_s3, 4  ;;  %s4551_s18 = int_to_ptr.vmem [resolvable:$false] %s4550_s18 }
 0x171   : > { %s4552_s19 = scalar_lea.vmem %s4551_s18, 32  ;;  %p4553_p3 = scmp.lt.s32.totalorder %s641_s10, %s4551_s18 }
 0x172   : > { %p4548_p2 = pnand %p4546_p8, %p5936_p12  ;;  %p4554_p11 = scmp.lt.s32.totalorder %s4552_s19, %s4545_s0 }
 0x174   : > { %p4549_p7 = pneg %p4548_p2  ;;  %p4555_p4 = por %p4554_p11, %p4553_p3 }
 0x176   : > { %p4556_p1 = pnand %p4555_p4, %p4549_p7 }
 0x178   : > { %4559 = shalt.err (!%p4556_p1)
}
 0x179   : > { %p5937_p13 = scmp.ne.s32.totalorder %s5912_s22, 0  ;;  %s5938_s6 = scalar_lea.sflag [#allocation10], %s5065_s16 }
 0x17a   : > { %s5939_s12 = sld [smem:[#allocation52_spill]]  ;;  %s671_s7 = scalar_lea.vmem [#allocation14], %s5011_s21 }
 0x17b   : > { %4045 = dma.hbm_to_vmem [thread:$0]  (!%p5937_p13), %s5342_s5, 16, %s641_s10, %s5938_s6  }
 0x17c   : > { %s678_s11 = sshll.u32 %s671_s7, 4  ;;  %s679_s11 = int_to_ptr.vmem [resolvable:$true] %s678_s11 }
 0x180   : > { %s5386_s13 = scalar_lea.hbm %s5939_s12, %s5132_s15  ;;  %s4565_s5 = scalar_lea.hbm %s5939_s12, 32 }
 0x181   : > { %s4560_s25 = scalar_lea.hbm %s5386_s13, 16  ;;  %p4566_p9 = scmp.lt.u32.totalorder %s5386_s13, %s5939_s12 }
 0x182   : > { %p4561_p5 = scmp.ne.s32.totalorder %s5386_s13, %s4560_s25  ;;  %p4567_p0 = scmp.lt.u32.totalorder %s4565_s5, %s4560_s25 }
 0x183   : > { %p4569_p2 = scmp.lt.u32.totalorder %s4560_s25, %s5386_s13 }
 0x184   : > { %p4563_p10 = pnand %p4561_p5, %p5936_p12  ;;  %p4568_p8 = por %p4567_p0, %p4566_p9 }
 0x186   : > { %p4564_p6 = pneg %p4563_p10  ;;  %p4570_p7 = por %p4569_p2, %p4568_p8 }
 0x188   : > { %p4571_p3 = pnand %p4570_p7, %p4564_p6 }
 0x18a   : > { %4574 = shalt.err (!%p4571_p3)
}
 0x18b   : > { %s4575_s1 = scalar_lea.vmem %s679_s11, 16  ;;  %s4840_s0 = smov [#allocation14]  }
 0x18c   : > { %p4576_p11 = scmp.ne.s32.totalorder %s679_s11, %s4575_s1  ;;  %s4580_s3 = sshll.u32 %s4840_s0, 4  ;;  %s4581_s3 = int_to_ptr.vmem [resolvable:$false] %s4580_s3 }
 0x18d   : > { %s4582_s18 = scalar_lea.vmem %s4581_s3, 32  ;;  %p4583_p5 = scmp.lt.s32.totalorder %s679_s11, %s4581_s3 }
 0x18e   : > { %p4578_p4 = pnand %p4576_p11, %p5936_p12  ;;  %p4584_p10 = scmp.lt.s32.totalorder %s4582_s18, %s4575_s1 }
 0x190   : > { %p4579_p1 = pneg %p4578_p4  ;;  %p4585_p13 = por %p4584_p10, %p4583_p5 }
 0x192   : > { %p4586_p0 = pnand %p4585_p13, %p4579_p1 }
 0x194   : > { %4589 = shalt.err (!%p4586_p0)
}
 0x195   : > { %p5940_p9 = scmp.ne.s32.totalorder %s5912_s22, 0  ;;  %s5941_s19 = scalar_lea.sflag [#allocation13], %s5065_s16 }
 0x196   : > { %s5942_s24 = sld [smem:[#allocation54_spill]]  ;;  %s705_s4 = scalar_lea.vmem [#allocation17], %s5011_s21 }
 0x197   : > { %4051 = dma.hbm_to_vmem [thread:$0]  (!%p5940_p9), %s5386_s13, 16, %s679_s11, %s5941_s19  }
 0x198   : > { %s712_s27 = sshll.u32 %s705_s4, 4  ;;  %s713_s27 = int_to_ptr.vmem [resolvable:$true] %s712_s27 }
 0x19c   : > { %s5943_s7 = smov %s5942_s24  ;;  %s5412_s25 = scalar_lea.hbm %s5942_s24, %s5132_s15 }
 0x19d   : > { %s4590_s5 = scalar_lea.hbm %s5412_s25, 16  ;;  %s4595_s13 = scalar_lea.hbm %s5943_s7, 32 }
 0x19e   : > { %p4591_p13 = scmp.ne.s32.totalorder %s5412_s25, %s4590_s5  ;;  %p4596_p2 = scmp.lt.u32.totalorder %s5412_s25, %s5943_s7 }
 0x19f   : > { %p4597_p7 = scmp.lt.u32.totalorder %s4595_s13, %s4590_s5  ;;  %p4599_p11 = scmp.lt.u32.totalorder %s4590_s5, %s5412_s25 }
 0x1a0   : > { %p4593_p6 = pnand %p4591_p13, %p5936_p12 }
 0x1a1   : > { %p4598_p3 = por %p4597_p7, %p4596_p2 }
 0x1a2   : > { %p4594_p8 = pneg %p4593_p6 }
 0x1a3   : > { %p4600_p4 = por %p4599_p11, %p4598_p3 }
 0x1a5   : > { %p4601_p1 = pnand %p4600_p4, %p4594_p8 }
 0x1a7   : > { %4604 = shalt.err (!%p4601_p1)
}
 0x1a8   : > { %s4605_s0 = scalar_lea.vmem %s713_s27, 16  ;;  %s4841_s3 = smov [#allocation17]  }
 0x1a9   : > { %p4606_p5 = scmp.ne.s32.totalorder %s713_s27, %s4605_s0  ;;  %s4610_s18 = sshll.u32 %s4841_s3, 4  ;;  %s4611_s18 = int_to_ptr.vmem [resolvable:$false] %s4610_s18 }
 0x1aa   : > { %s4612_s19 = scalar_lea.vmem %s4611_s18, 32  ;;  %p4613_p13 = scmp.lt.s32.totalorder %s713_s27, %s4611_s18 }
 0x1ab   : > { %p4608_p10 = pnand %p4606_p5, %p5936_p12  ;;  %p4614_p6 = scmp.lt.s32.totalorder %s4612_s19, %s4605_s0 }
 0x1ad   : > { %p4609_p0 = pneg %p4608_p10  ;;  %p4615_p9 = por %p4614_p6, %p4613_p13 }
 0x1af   : > { %p4616_p2 = pnand %p4615_p9, %p4609_p0 }
 0x1b1   : > { %4619 = shalt.err (!%p4616_p2)
}
 0x1b2   : > { %p5944_p7 = scmp.ne.s32.totalorder %s5912_s22, 0  ;;  %s5945_s6 = scalar_lea.sflag [#allocation16], %s5065_s16 }
 0x1b3   : > { %s5946_s4 = sld [smem:[#allocation56_spill]]  ;;  %s743_s10 = scalar_lea.vmem [#allocation20], %s5011_s21 }
 0x1b4   : > { %4057 = dma.hbm_to_vmem [thread:$0]  (!%p5944_p7), %s5412_s25, 16, %s713_s27, %s5945_s6  }
 0x1b5   : > { %s750_s20 = sshll.u32 %s743_s10, 4  ;;  %s751_s20 = int_to_ptr.vmem [resolvable:$true] %s750_s20 }
 0x1b9   : > { %s5438_s5 = scalar_lea.hbm %s5946_s4, %s5132_s15  ;;  %s4625_s25 = scalar_lea.hbm %s5946_s4, 32 }
 0x1ba   : > { %s4620_s13 = scalar_lea.hbm %s5438_s5, 16  ;;  %p4626_p11 = scmp.lt.u32.totalorder %s5438_s5, %s5946_s4 }
 0x1bb   : > { %p4621_p9 = scmp.ne.s32.totalorder %s5438_s5, %s4620_s13  ;;  %p4627_p4 = scmp.lt.u32.totalorder %s4625_s25, %s4620_s13 }
 0x1bc   : > { %p4629_p5 = scmp.lt.u32.totalorder %s4620_s13, %s5438_s5 }
 0x1bd   : > { %p4623_p8 = pnand %p4621_p9, %p5936_p12  ;;  %p4628_p1 = por %p4627_p4, %p4626_p11 }
 0x1bf   : > { %p4624_p3 = pneg %p4623_p8  ;;  %p4630_p10 = por %p4629_p5, %p4628_p1 }
 0x1c1   : > { %p4631_p0 = pnand %p4630_p10, %p4624_p3 }
 0x1c3   : > { %4634 = shalt.err (!%p4631_p0)
}
 0x1c4   : > { %s4635_s3 = scalar_lea.vmem %s751_s20, 16  ;;  %s4842_s18 = smov [#allocation20]  }
 0x1c5   : > { %p4636_p13 = scmp.ne.s32.totalorder %s751_s20, %s4635_s3  ;;  %s4640_s19 = sshll.u32 %s4842_s18, 4  ;;  %s4641_s19 = int_to_ptr.vmem [resolvable:$false] %s4640_s19 }
 0x1c6   : > { %s4642_s6 = scalar_lea.vmem %s4641_s19, 32  ;;  %p4643_p9 = scmp.lt.s32.totalorder %s751_s20, %s4641_s19 }
 0x1c7   : > { %p4638_p6 = pnand %p4636_p13, %p5936_p12  ;;  %p4644_p8 = scmp.lt.s32.totalorder %s4642_s6, %s4635_s3 }
 0x1c9   : > { %p4639_p2 = pneg %p4638_p6  ;;  %p4645_p7 = por %p4644_p8, %p4643_p9 }
 0x1cb   : > { %p4646_p4 = pnand %p4645_p7, %p4639_p2 }
 0x1cd   : > { %4649 = shalt.err (!%p4646_p4)
}
 0x1ce   : > { %p5947_p11 = scmp.ne.s32.totalorder %s5912_s22, 0  ;;  %s5948_s23 = scalar_lea.sflag [#allocation19], %s5065_s16 }
 0x1cf   : > { %s5949_s13 = sld [smem:[#allocation58_spill]]  ;;  %s781_s1 = scalar_lea.vmem [#allocation23], %s5011_s21 }
 0x1d0   : > { %4063 = dma.hbm_to_vmem [thread:$0]  (!%p5947_p11), %s5438_s5, 16, %s751_s20, %s5948_s23  }
 0x1d1   : > { %s788_s25 = sshll.u32 %s781_s1, 4  ;;  %s789_s25 = int_to_ptr.vmem [resolvable:$true] %s788_s25 }
 0x1d5   : > { %s5464_s11 = scalar_lea.hbm %s5949_s13, %s5132_s15  ;;  %s4655_s5 = scalar_lea.hbm %s5949_s13, 32 }
 0x1d6   : > { %s4650_s27 = scalar_lea.hbm %s5464_s11, 16  ;;  %p4656_p5 = scmp.lt.u32.totalorder %s5464_s11, %s5949_s13 }
 0x1d7   : > { %p4651_p7 = scmp.ne.s32.totalorder %s5464_s11, %s4650_s27  ;;  %p4657_p10 = scmp.lt.u32.totalorder %s4655_s5, %s4650_s27 }
 0x1d8   : > { %p4659_p13 = scmp.lt.u32.totalorder %s4650_s27, %s5464_s11 }
 0x1d9   : > { %p4653_p3 = pnand %p4651_p7, %p5936_p12  ;;  %p4658_p0 = por %p4657_p10, %p4656_p5 }
 0x1db   : > { %p4654_p1 = pneg %p4653_p3  ;;  %p4660_p6 = por %p4659_p13, %p4658_p0 }
 0x1dd   : > { %p4661_p2 = pnand %p4660_p6, %p4654_p1 }
 0x1df   : > { %4664 = shalt.err (!%p4661_p2)
}
 0x1e0   : > { %s4665_s19 = scalar_lea.vmem %s789_s25, 16  ;;  %s4843_s6 = smov [#allocation23]  }
 0x1e1   : > { %p4666_p9 = scmp.ne.s32.totalorder %s789_s25, %s4665_s19  ;;  %s4670_s23 = sshll.u32 %s4843_s6, 4  ;;  %s4671_s23 = int_to_ptr.vmem [resolvable:$false] %s4670_s23 }
 0x1e2   : > { %s4672_s24 = scalar_lea.vmem %s4671_s23, 32  ;;  %p4673_p7 = scmp.lt.s32.totalorder %s789_s25, %s4671_s23 }
 0x1e3   : > { %p4668_p8 = pnand %p4666_p9, %p5936_p12  ;;  %p4674_p3 = scmp.lt.s32.totalorder %s4672_s24, %s4665_s19 }
 0x1e5   : > { %p4669_p4 = pneg %p4668_p8  ;;  %p4675_p11 = por %p4674_p3, %p4673_p7 }
 0x1e7   : > { %p4676_p5 = pnand %p4675_p11, %p4669_p4 }
 0x1e9   : > { %4679 = shalt.err (!%p4676_p5)
}
 0x1ea   : > { %p5950_p10 = scmp.ne.s32.totalorder %s5912_s22, 0  ;;  %s5951_s10 = scalar_lea.sflag [#allocation22], %s5065_s16 }
 0x1eb   : > { %s5952_s0 = sld [smem:[#allocation60_spill]]  ;;  %s815_s5 = scalar_lea.vmem [#allocation26], %s5011_s21 }
 0x1ec   : > { %4069 = dma.hbm_to_vmem [thread:$0]  (!%p5950_p10), %s5464_s11, 16, %s789_s25, %s5951_s10  }
 0x1ed   : > { %s822_s20 = sshll.u32 %s815_s5, 4  ;;  %s823_s20 = int_to_ptr.vmem [resolvable:$true] %s822_s20 }
 0x1f1   : > { %s5490_s3 = scalar_lea.hbm %s5952_s0, %s5132_s15  ;;  %s4685_s11 = scalar_lea.hbm %s5952_s0, 32 }
 0x1f2   : > { %s4680_s18 = scalar_lea.hbm %s5490_s3, 16  ;;  %p4686_p13 = scmp.lt.u32.totalorder %s5490_s3, %s5952_s0 }
 0x1f3   : > { %p4681_p11 = scmp.ne.s32.totalorder %s5490_s3, %s4680_s18  ;;  %p4687_p6 = scmp.lt.u32.totalorder %s4685_s11, %s4680_s18 }
 0x1f4   : > { %p4689_p9 = scmp.lt.u32.totalorder %s4680_s18, %s5490_s3 }
 0x1f5   : > { %p4683_p1 = pnand %p4681_p11, %p5936_p12  ;;  %p4688_p2 = por %p4687_p6, %p4686_p13 }
 0x1f7   : > { %p4684_p0 = pneg %p4683_p1  ;;  %p4690_p8 = por %p4689_p9, %p4688_p2 }
 0x1f9   : > { %p4691_p4 = pnand %p4690_p8, %p4684_p0 }
 0x1fb   : > { %4694 = shalt.err (!%p4691_p4)
}
 0x1fc   : > { %s4695_s15 = scalar_lea.vmem %s823_s20, 16  ;;  %s4844_s21 = smov [#allocation26]  }
 0x1fd   : > { %p4696_p7 = scmp.ne.s32.totalorder %s823_s20, %s4695_s15  ;;  %s4700_s24 = sshll.u32 %s4844_s21, 4  ;;  %s4701_s24 = int_to_ptr.vmem [resolvable:$false] %s4700_s24 }
 0x1fe   : > { %s4702_s10 = scalar_lea.vmem %s4701_s24, 32  ;;  %p4703_p11 = scmp.lt.s32.totalorder %s823_s20, %s4701_s24 }
 0x1ff   : > { %p4698_p3 = pnand %p4696_p7, %p5936_p12  ;;  %p4704_p1 = scmp.lt.s32.totalorder %s4702_s10, %s4695_s15 }
 0x201   : > { %p4699_p5 = pneg %p4698_p3  ;;  %p4705_p10 = por %p4704_p1, %p4703_p11 }
 0x203   : > { %p4706_p6 = pnand %p4705_p10, %p4699_p5 }
 0x205   : > { %4709 = shalt.err (!%p4706_p6)
}
 0x206   : > { %p5953_p13 = scmp.ne.s32.totalorder %s5912_s22, 0  ;;  %s5954_s1 = scalar_lea.sflag [#allocation25], %s5065_s16 }
 0x207   : > { %s5955_s27 = sld [smem:[#allocation45_spill]] }
 0x208   : > { %4075 = dma.hbm_to_vmem [thread:$0]  (!%p5953_p13), %s5490_s3, 16, %s823_s20, %s5954_s1  }
 0x20d   : > { %p5956_p0 = scmp.ne.s32.totalorder %s5955_s27, 0 }
 0x20e   : > { %s5957_s30 = sld [smem:[#allocation43_spill]] (!%p5956_p0) }
 0x20f   : > { %831 = sbr.rel (%p5956_p0) target bundleno = 4741 (0x1285), region = 88 }
 0x214   : > { %p5958_p12 = scmp.eq.s32.totalorder (!%p5956_p0), %s5957_s30, 0 }
 0x216   : > { %4761 = dma.done.wait (%p5958_p12), [#allocation4], 256   ;;  %p5959_p2 = pmov %p5958_p12 }
 0x218   : > { %4763 = vsyncadd (%p5959_p2), [#allocation4], 4294967040  ;;  %p5960_p9 = pmov %p5959_p2 }
 0x219   : > { %p5961_p10 = pmov %p5959_p2 }
 0x21a   : > { %4765 = dma.done.wait (%p5960_p9), [#allocation7], 288  }
 0x21b   : > { %4767 = vsyncadd (%p5961_p10), [#allocation7], 4294967008  ;;  %s5962_s22 = sld [smem:[#allocation41_spill]]  ;;  %s5963_s16 = sld [smem:[#allocation44_spill]] }
 0x21c   : > { %s5523_s5 = sand.u32 1, %s5957_s30  }
 0x21d   : > { %s846_s18 = scalar_lea.sflag [#allocation10], %s5523_s5 }
 0x221   : > { %s5526_s3 = sand.u32 1, %s5962_s22   ;;  %p5964_p8 = scmp.ne.s32.totalorder %s5963_s16, 0 }
 0x222   : > { %s3639_s20 = sshll.u32 %s5526_s3, 5 }
 0x223   : > { %s5530_s19 = scalar_lea.vmem [#allocation9], %s3639_s20 }
 0x224   : > { %4769 = dma.done.wait (%p5964_p8), %s846_s18, 528  }
 0x225   : > { %4771 = vsyncadd (%p5964_p8), %s846_s18, 4294966768  ;;  %s857_s6 = scalar_lea.vmem [#allocation11], %s5526_s3  ;;  %s863_s11 = scalar_lea.sflag [#allocation13], %s5523_s5 }
 0x226   : > { %s5538_s25 = scalar_lea.vmem [#allocation12], %s3639_s20 }
 0x227   : > { %4773 = dma.done.wait (%p5964_p8), %s863_s11, 528  }
 0x228   : > { %4775 = vsyncadd (%p5964_p8), %s863_s11, 4294966768  ;;  %s874_s23 = scalar_lea.vmem [#allocation14], %s5526_s3  ;;  %s880_s15 = scalar_lea.sflag [#allocation16], %s5523_s5 }
 0x229   : > { %s882_s21 = scalar_lea.vmem [#allocation15], %s5526_s3 }
 0x22a   : > { %4777 = dma.done.wait (%p5964_p8), %s880_s15, 32  }
 0x22b   : > { %4779 = vsyncadd (%p5964_p8), %s880_s15, 4294967264  ;;  %s890_s24 = scalar_lea.vmem [#allocation17], %s5526_s3  ;;  %s896_s10 = scalar_lea.sflag [#allocation19], %s5523_s5 }
 0x22c   : > { %s5553_s1 = scalar_lea.vmem [#allocation18], %s3639_s20 }
 0x22d   : > { %4781 = dma.done.wait (%p5964_p8), %s896_s10, 528  }
 0x22e   : > { %4783 = vsyncadd (%p5964_p8), %s896_s10, 4294966768  ;;  %s3642_s27 = sshll.u32 %s5526_s3, 6  ;;  %s907_s22 = scalar_lea.vmem [#allocation20], %s5526_s3 }
 0x22f   : > { %s913_s18 = scalar_lea.sflag [#allocation22], %s5523_s5  ;;  %s5562_s11 = scalar_lea.vmem [#allocation21], %s3642_s27 }
 0x230   : > { %4785 = dma.done.wait (%p5964_p8), %s913_s18, 1040  }
 0x231   : > { %4787 = vsyncadd (%p5964_p8), %s913_s18, 4294966256  ;;  %s924_s20 = scalar_lea.vmem [#allocation23], %s5526_s3  ;;  %s930_s15 = scalar_lea.sflag [#allocation25], %s5523_s5 }
 0x232   : > { %s932_s10 = scalar_lea.vmem [#allocation24], %s5526_s3 }
 0x233   : > { %4789 = dma.done.wait (%p5964_p8), %s930_s15, 32  }
 0x234   : > { %4791 = vsyncadd (%p5964_p8), %s930_s15, 4294967264  ;;  %s940_s27 = scalar_lea.vmem [#allocation26], %s5526_s3  ;;  %p5965_p4 = pmov %p5959_p2 }
 0x235   : > { %p5966_p7 = pmov %p5959_p2 }
 0x236   : > { %4793 = dma.done.wait (%p5965_p4), [#allocation28], 528  }
 0x237   : > { %4795 = vsyncadd (%p5966_p7), [#allocation28], 4294966768  ;;  %s5967_s18 = sld [smem:[#allocation42_spill]] }
 0x23d   : > { %p3645_p3 = scmp.ne.s32.totalorder %s5967_s18, 0 }
 0x23e   : > { %v1048_v0 = vld [vmem:[#allocation3] sm:$0xff] (!%p3645_p3)  ;;  %vm1050_vm0 = vcmask (!%p3645_p3), 261120   ;;  %v1049_v1 = vld [vmem:[#allocation3 + $0x8] sm:$0xff] (!%p3645_p3) }
 0x23f   : > { %1047 = sbr.rel (%p3645_p3) target bundleno = 582 (0x246), region = 160  ;;  %1051 = vst.msk [vmem:[#allocation2] sm:$0xff] (!%p3645_p3), %vm1050_vm0, %v1048_v0  ;;  %1052 = vst.msk [vmem:[#allocation2 + $0x8] sm:$0xff] (!%p3645_p3), %vm1050_vm0, %v1049_v1 }
 0x246 PF: > { %v1055_v2 = vld [vmem:[%s5530_s19] sm:$0xff]  ;;  %v1056_v3 = vld [vmem:[%s5530_s19 + $0x8] sm:$0xff]  ;;  %v1057_v4 = vld [vmem:[%s5530_s19 + $0x10] sm:$0xff]  ;;  %vm1066_vm1 = vcmask 261120   ;;  %v4845_v10 = vmov 0.0   ;;  %vm4846_vm2 = vmmov 0  }
 0x247   : > { %v3931_v5 = vpack.c.bf16 %v1056_v3, %v1055_v2  ;;  %v1058_v6 = vld [vmem:[%s5530_s19 + $0x18] sm:$0xff]  ;;  %v5585_v7 = vld [vmem:[#allocation2] sm:$0xff]  ;;  %3800 = vmatprep.subr.mxu0 %v4845_v10  ;;  %3802 = vmatprep.mubr.msk.f32.mxu0 %vm4846_vm2, %v4845_v10  ;;  %s4847_s30 = smov 96   ;;  %s4848_s16 = smov 64   ;;  %vm1165_vm3 = vcmask 64512   ;;  %vm2985_vm4 = vcmask 523264  }
 0x248   : > { %v3935_v8 = vpack.c.bf16 %v1058_v6, %v1057_v4  ;;  %3787 = vmatprep.mubr.msk.f32.mxu1 %vm1066_vm1, %v5585_v7  ;;  %v5589_v9 = vld [vmem:[#allocation2 + $0x8] sm:$0xff]  ;;  %v3646_v11 = vld [vmem:[%s857_s6] ss:$0 sm:$0xff]  ;;  %s4849_s5 = smov 120   ;;  %v5625_v23 = vld [vmem:[#allocation6 + $0x1] ss:$0 sm:$0xff] }
 0x249   : > { %3932 = vmatprep.subr.bf16.mxu1 %v3931_v5  ;;  %v5622_v19 = vld [vmem:[#allocation6] ss:$0 sm:$0xff]  ;;  %s4850_s19 = smov 88   ;;  %s4851_s6 = smov 80  }
 0x24a   : > { %3934 = vmatpush3.bf16.msra.mxu1 %v3931_v5  ;;  %s4852_s15 = smov 56   ;;  %s4853_s18 = smov 112  }
 0x24b   : > { %3936 = vmatprep.subr.bf16.mxu1 %v3935_v8 }
 0x24e   : > { %3938 = vmatpush3.bf16.msra.mxu1 %v3935_v8 }
 0x24f   : > { %3790 = vmatprep.subr.mxu1 %v4845_v10 }
 0x251   : > { %3788 = vmatmul.mubr.msk.f32.vlgmr.msra.gmra.mrb[0].mxu1 %vm1066_vm1, %v5589_v9 }
 0x252   : > { %3792 = vmatprep.mubr.msk.f32.mxu1 %vm4846_vm2, %v4845_v10 }
 0x324   : > { %v3789_v12 = vpop.f32.mrb[0].mxu1 }
 0x325   : > { %v1139_v13 = vpop.f32.mrb[1].mxu1  ;;  %v5604_v15 = vadd.f32 %v3789_v12, %v3646_v11 }
 0x326   : > { %v5601_v14 = vadd.f32 %v3646_v11, %v1139_v13 }
 0x328   : > { %1163 = vrot.lane.b32.xlu0 %v5601_v14, %s4847_s30 }
 0x32c   : > { %1241 = vrot.lane.b32.xlu0 %v5604_v15, %s4847_s30  ;;  %s4854_s30 = smov 48  }
 0x330   : > { %1415 = vrot.lane.b32.xlu0 %v5604_v15, %s4848_s16 }
 0x334   : > { %1570 = vrot.lane.b32.xlu0 %v5604_v15, %s4849_s5 }
 0x39a   : > { %v1164_v16 = vpop.permute.xlu0 %1163 }
 0x39b   : > { %3791 = vmatpush3.xpose.msk.msra.mxu1 %vm1165_vm3, %v1164_v16 }
 0x39c   : > { %3795 = vmatprep.subr.mxu1 %v4845_v10 }
 0x39e   : > { %3793 = vmatmul.mubr.msk.f32.vlgmr.msra.gmra.mrb[2].mxu1 %vm1165_vm3, %v5601_v14  ;;  %v1242_v17 = vpop.permute.xlu0 %1241 }
 0x39f   : > { %3796 = vmatpush3.xpose.msk.msra.mxu1 %vm1165_vm3, %v1242_v17  ;;  %3797 = vmatprep.mubr.msk.f32.mxu1 %vm4846_vm2, %v4845_v10 }
 0x3a0   : > { %3805 = vmatprep.subr.mxu1 %v4845_v10 }
 0x3a2   : > { %3798 = vmatmul.mubr.msk.f32.vlgmr.msra.gmra.mrb[4].mxu1 %vm1165_vm3, %v5604_v15  ;;  %v1416_v18 = vpop.permute.xlu0 %1415 }
 0x3a3   : > { %3806 = vmatpush3.msra.mxu1 %v1416_v18  ;;  %3807 = vmatprep.mubr.msk.f32.mxu1 %vm4846_vm2, %v4845_v10 }
 0x3a4   : > { %3815 = vmatprep.subr.mxu1 %v4845_v10 }
 0x3a6   : > { %v1571_v29 = vpop.permute.xlu0 %1570 }
 0x471   : > { %v1236_v20 = vpop.f32.mrb[2].mxu1 }
 0x472   : > { %v1237_v21 = vadd.f32 %v5622_v19, %v1236_v20  ;;  %v3794_v22 = vpop.f32.mrb[3].mxu1 }
 0x474   : > { %v1317_v24 = vsel %vm1165_vm3, %v1237_v21, -inf }
 0x475   : > { %1318 = vmax.xlane.f32.xlu0 %v1317_v24  ;;  %v1313_v25 = vpop.f32.mrb[4].mxu1 }
 0x476   : > { %v1314_v26 = vadd.f32 %v5625_v23, %v1313_v25  ;;  %v3799_v27 = vpop.f32.mrb[5].mxu1 }
 0x477   : > { %v3663_v27 = vld [vmem:[%s5538_s25 + $0x8] sm:$0xff] }
 0x478   : > { %v1320_v28 = vsel %vm1165_vm3, %v1314_v26, -inf }
 0x479   : > { %1321 = vmax.xlane.f32.xlu1 %v1320_v28  ;;  %v1491_v28 = vld [vmem:[%s5538_s25] sm:$0xff] }
 0x48b   : > { %1339 = vrot.lane.b32.xlu0 %v5601_v14, %s4848_s16  ;;  %s4855_s16 = smov 72  }
 0x48f   : > { %1492 = vrot.lane.b32.xlu0 %v5601_v14, %s4849_s5  ;;  %s4856_s5 = smov 104  }
 0x502   : > { %v1319_v30 = vpop.xlane.xlu0 %1318 }
 0x503   : > { %v1323_v37 = vsub.f32 %v1237_v21, %v1319_v30 }
 0x505   : > { %v1325_v38 = vmul.f32 1.442695, %v1323_v37 }
 0x506   : > { %v1322_v31 = vpop.xlane.xlu1 %1321  ;;  %v1340_v32 = vpop.permute.xlu0 %1339 }
 0x507   : > { %v1324_v33 = vsub.f32 %v1314_v26, %v1322_v31  ;;  %3801 = vmatpush3.msra.mxu0 %v1340_v32 }
 0x508   : > { %3810 = vmatprep.subr.mxu0 %v4845_v10 }
 0x509   : > { %v1327_v34 = vmul.f32 1.442695, %v1324_v33 }
 0x50a   : > { %v1493_v49 = vpop.permute.xlu0 %1492 }
 0x50b   : > { %4164 = vpow2.f32 %v1327_v34 }
 0x50c   : > { %4166 = vpow2.f32 %v1325_v38 }
 0x515   : > { %v4165_v35 = vpop.eup %4164 }
 0x516   : > { %v1332_v36 = vsel %vm1165_vm3, %v4165_v35, 0.0  ;;  %v4167_v39 = vpop.eup %4166 }
 0x517   : > { %1333 = vadd.xlane.f32.xlu1 %v1332_v36  ;;  %v1329_v40 = vsel %vm1165_vm3, %v4167_v39, 0.0 }
 0x528   : > { %1572 = vrot.lane.b32.xlu1 %v5604_v15, %s4850_s19 }
 0x54c   : > { %1330 = vadd.xlane.f32.xlu1 %v1329_v40 }
 0x55d   : > { %1494 = vrot.lane.b32.xlu1 %v5601_v14, %s4850_s19  ;;  %s4857_s19 = smov 40  }
 0x561   : > { %1988 = vrot.lane.b32.xlu1 %v5601_v14, %s4851_s6 }
 0x5a4   : > { %v1334_v41 = vpop.xlane.xlu1 %1333 }
 0x5a5   : > { %4168 = vrcp.f32 %v1334_v41 }
 0x5a8   : > { %v1573_v44 = vpop.permute.xlu1 %1572 }
 0x5af   : > { %v4169_v42 = vpop.eup %4168 }
 0x5b0   : > { %v1338_v43 = vmul.f32 %v4169_v42, %v4165_v35 }
 0x5b2   : > { %3808 = vmatmul.mubr.msk.f32.vlgmr.msra.gmra.mrb[6].mxu1 %vm1165_vm3, %v1338_v43 }
 0x5b3   : > { %3816 = vmatpush3.xpose.msk.msra.mxu1 %vm1165_vm3, %v1573_v44  ;;  %3817 = vmatprep.mubr.msk.f32.mxu1 %vm4846_vm2, %v4845_v10 }
 0x5b4   : > { %3825 = vmatprep.subr.mxu1 %v4845_v10 }
 0x5b6   : > { %3818 = vmatmul.mubr.msk.f32.vlgmr.msra.gmra.mrb[8].mxu1 %vm1165_vm3, %v1571_v29 }
 0x5b7   : > { %3827 = vmatprep.mubr.msk.f32.mxu1 %vm4846_vm2, %v4845_v10 }
 0x5d9   : > { %v1331_v45 = vpop.xlane.xlu1 %1330 }
 0x5da   : > { %4170 = vrcp.f32 %v1331_v45 }
 0x5dd   : > { %v1495_v48 = vpop.permute.xlu1 %1494 }
 0x5e1   : > { %v1989_v17 = vpop.permute.xlu1 %1988 }
 0x5e4   : > { %v4171_v46 = vpop.eup %4170 }
 0x5e5   : > { %v1337_v47 = vmul.f32 %v4171_v46, %v4167_v39 }
 0x5e7   : > { %3803 = vmatmul.mubr.msk.f32.vlgmr.msra.gmra.mrb[0].mxu0 %vm1165_vm3, %v1337_v47 }
 0x5e8   : > { %3811 = vmatpush3.xpose.msk.msra.mxu0 %vm1165_vm3, %v1495_v48  ;;  %3812 = vmatprep.mubr.msk.f32.mxu0 %vm4846_vm2, %v4845_v10 }
 0x5e9   : > { %3820 = vmatprep.subr.mxu0 %v4845_v10 }
 0x5eb   : > { %3813 = vmatmul.mubr.msk.f32.vlgmr.msra.gmra.mrb[2].mxu0 %vm1165_vm3, %v1493_v49 }
 0x5ec   : > { %3822 = vmatprep.mubr.msk.f32.mxu0 %vm4846_vm2, %v4845_v10 }
 0x685   : > { %v5655_v50 = vpop.f32.mrb[6].mxu1 }
 0x686   : > { %v3809_v51 = vpop.f32.mrb[7].mxu1 }
 0x689   : > { %v1644_v52 = vpop.f32.mrb[8].mxu1 }
 0x68a   : > { %v1645_v53 = vadd.f32 %v5625_v23, %v1644_v52  ;;  %v3819_v54 = vpop.f32.mrb[9].mxu1  ;;  %v3674_v52 = vld [vmem:[%s5538_s25 + $0x10] sm:$0xff] }
 0x68c   : > { %v1651_v55 = vsel %vm1165_vm3, %v1645_v53, -inf }
 0x68d   : > { %1652 = vmax.xlane.f32.xlu0 %v1651_v55 }
 0x6a3   : > { %1746 = vrot.lane.b32.xlu0 %v5604_v15, %s4852_s15 }
 0x6a7   : > { %1986 = vrot.lane.b32.xlu0 %v5601_v14, %s4853_s18 }
 0x6ab   : > { %2066 = vrot.lane.b32.xlu0 %v5604_v15, %s4851_s6 }
 0x6ba   : > { %v5663_v56 = vpop.f32.mrb[0].mxu0 }
 0x6bb   : > { %v3804_v57 = vpop.f32.mrb[1].mxu0 }
 0x6be   : > { %v1566_v58 = vpop.f32.mrb[2].mxu0 }
 0x6bf   : > { %v3814_v59 = vpop.f32.mrb[3].mxu0  ;;  %v1567_v60 = vadd.f32 %v5622_v19, %v1566_v58 }
 0x6c1   : > { %v1648_v61 = vsel %vm1165_vm3, %v1567_v60, -inf }
 0x6ca   : > { %1649 = vmax.xlane.f32.xlu0 %v1648_v61 }
 0x6e0   : > { %1670 = vrot.lane.b32.xlu0 %v5601_v14, %s4852_s15 }
 0x6e4   : > { %2164 = vrot.lane.b32.xlu0 %v5601_v14, %s4854_s30 }
 0x6e8   : > { %2403 = vrot.lane.b32.xlu0 %v5601_v14, %s4855_s16 }
 0x6ec   : > { %2481 = vrot.lane.b32.xlu0 %v5604_v15, %s4855_s16 }
 0x6f0   : > { %2401 = vrot.lane.b32.xlu0 %v5601_v14, %s4856_s5 }
 0x6f4   : > { %2479 = vrot.lane.b32.xlu0 %v5604_v15, %s4856_s5 }
 0x71a   : > { %v1653_v62 = vpop.xlane.xlu0 %1652 }
 0x71b   : > { %v1655_v63 = vsub.f32 %v1645_v53, %v1653_v62 }
 0x71d   : > { %v1658_v0 = vmul.f32 1.442695, %v1655_v63 }
 0x71e   : > { %v1747_v1 = vpop.permute.xlu0 %1746 }
 0x71f   : > { %4172 = vpow2.f32 %v1658_v0  ;;  %3826 = vmatpush3.msra.mxu1 %v1747_v1 }
 0x720   : > { %3840 = vmatprep.subr.mxu1 %v4845_v10 }
 0x722   : > { %v1987_v4 = vpop.permute.xlu0 %1986 }
 0x726   : > { %v2067_v5 = vpop.permute.xlu0 %2066 }
 0x729   : > { %v4173_v2 = vpop.eup %4172 }
 0x72a   : > { %v1663_v3 = vsel %vm1165_vm3, %v4173_v2, 0.0 }
 0x72b   : > { %1664 = vadd.xlane.f32.xlu1 %v1663_v3 }
 0x73c   : > { %2064 = vrot.lane.b32.xlu1 %v5604_v15, %s4853_s18 }
 0x757   : > { %v1650_v6 = vpop.xlane.xlu0 %1649 }
 0x758   : > { %v1654_v8 = vsub.f32 %v1567_v60, %v1650_v6 }
 0x75a   : > { %v1656_v11 = vmul.f32 1.442695, %v1654_v8 }
 0x75b   : > { %v1671_v12 = vpop.permute.xlu0 %1670 }
 0x75c   : > { %4174 = vpow2.f32 %v1656_v11  ;;  %3821 = vmatpush3.msra.mxu0 %v1671_v12 }
 0x75d   : > { %3830 = vmatprep.subr.mxu0 %v3663_v27 }
 0x75f   : > { %v2165_v41 = vpop.permute.xlu0 %2164 }
 0x766   : > { %v4175_v13 = vpop.eup %4174 }
 0x767   : > { %v1660_v16 = vsel %vm1165_vm3, %v4175_v13, 0.0 }
 0x768   : > { %1661 = vadd.xlane.f32.xlu1 %v1660_v16 }
 0x7b8   : > { %v1665_v18 = vpop.xlane.xlu1 %1664 }
 0x7b9   : > { %4176 = vrcp.f32 %v1665_v18 }
 0x7bc   : > { %v2065_v22 = vpop.permute.xlu1 %2064 }
 0x7c3   : > { %v4177_v20 = vpop.eup %4176 }
 0x7c4   : > { %v1669_v21 = vmul.f32 %v4177_v20, %v4173_v2 }
 0x7c6   : > { %3828 = vmatmul.mubr.msk.f32.vlgmr.msra.gmra.mrb[10].mxu1 %vm1165_vm3, %v1669_v21 }
 0x7c7   : > { %3841 = vmatpush3.xpose.msk.msra.mxu1 %vm1165_vm3, %v1989_v17  ;;  %3842 = vmatprep.mubr.msk.f32.mxu1 %vm4846_vm2, %v4845_v10 }
 0x7c8   : > { %3845 = vmatprep.subr.mxu1 %v4845_v10 }
 0x7ca   : > { %3843 = vmatmul.mubr.msk.f32.vlgmr.msra.gmra.mrb[12].mxu1 %vm1165_vm3, %v1987_v4 }
 0x7cb   : > { %3846 = vmatpush3.xpose.msk.msra.mxu1 %vm1165_vm3, %v2067_v5  ;;  %3847 = vmatprep.mubr.msk.f32.mxu1 %vm4846_vm2, %v4845_v10 }
 0x7cc   : > { %3855 = vmatprep.subr.mxu1 %v4845_v10 }
 0x7ce   : > { %3848 = vmatmul.mubr.msk.f32.vlgmr.msra.gmra.mrb[14].mxu1 %vm1165_vm3, %v2065_v22 }
 0x7cf   : > { %3857 = vmatprep.mubr.msk.f32.mxu1 %vm4846_vm2, %v4845_v10 }
 0x7f5   : > { %v1662_v24 = vpop.xlane.xlu1 %1661 }
 0x7f6   : > { %4178 = vrcp.f32 %v1662_v24 }
 0x800   : > { %v4179_v25 = vpop.eup %4178 }
 0x801   : > { %v1668_v26 = vmul.f32 %v4179_v25, %v4175_v13 }
 0x803   : > { %3823 = vmatmul.mubr.msk.f32.vlgmr.msra.gmra.mrb[4].mxu0 %vm1165_vm3, %v1668_v26 }
 0x804   : > { %3831 = vmatpush3.msra.mxu0 %v3663_v27 }
 0x805   : > { %3835 = vmatprep.subr.mxu0 %v1491_v28 }
 0x899   : > { %v1818_v29 = vpop.f32.mrb[10].mxu1 }
 0x89a   : > { %v3829_v30 = vpop.f32.mrb[11].mxu1 }
 0x89b   : > { %v3683_v30 = vld [vmem:[%s5538_s25 + $0x18] sm:$0xff]  ;;  %s5968_s25 = sld [smem:[#allocation42_spill]] }
 0x89d   : > { %v2060_v31 = vpop.f32.mrb[12].mxu1 }
 0x89e   : > { %v2061_v32 = vadd.f32 %v5622_v19, %v2060_v31  ;;  %v3844_v33 = vpop.f32.mrb[13].mxu1 }
 0x8a0   : > { %v2142_v34 = vsel %vm1165_vm3, %v2061_v32, -inf }
 0x8a1   : > { %v2138_v35 = vpop.f32.mrb[14].mxu1  ;;  %2143 = vmax.xlane.f32.xlu1 %v2142_v34  ;;  %p3697_p5 = scmp.ne.s32.totalorder %s5968_s25, 1 }
 0x8a2   : > { %v2139_v36 = vadd.f32 %v5625_v23, %v2138_v35  ;;  %v3849_v37 = vpop.f32.mrb[15].mxu1  ;;  %vm3151_vm5 = vcmask (!%p3697_p5), 7168   ;;  %vm4860_vm6 = vmmov (!%p3697_p5), 0   ;;  %vm3195_vm7 = vcmask (!%p3697_p5), 1041409  }
 0x8a4   : > { %v2145_v38 = vsel %vm1165_vm3, %v2139_v36, -inf }
 0x8a5   : > { %2146 = vmax.xlane.f32.xlu1 %v2145_v38 }
 0x8d6   : > { %v1742_v39 = vpop.f32.mrb[4].mxu0 }
 0x8d7   : > { %v3824_v40 = vpop.f32.mrb[5].mxu0  ;;  %3832 = vmatprep.mubr.msk.f32.mxu0 %vm1165_vm3, %v1742_v39 }
 0x8d8   : > { %3833 = vmatmul.mubr.msk.f32.vlgmr.msra.gmra.mrb[6].mxu0 %vm1165_vm3, %v1818_v29 }
 0x8d9   : > { %3837 = vmatprep.mubr.msk.f32.mxu0 %vm1165_vm3, %v5663_v56  ;;  %3836 = vmatpush3.msra.mxu0 %v1491_v28  ;;  %v2404_v56 = vpop.permute.xlu0 %2403 }
 0x8da   : > { %3850 = vmatprep.subr.mxu0 %v4845_v10 }
 0x8dd   : > { %v2482_v60 = vpop.permute.xlu0 %2481 }
 0x8e0   : > { %3838 = vmatmul.mubr.msk.f32.vlgmr.msra.gmra.mrb[6].mxu0 %vm1165_vm3, %v5655_v50 }
 0x8e1   : > { %3851 = vmatpush3.msra.mxu0 %v2165_v41  ;;  %3852 = vmatprep.mubr.msk.f32.mxu0 %vm4846_vm2, %v4845_v10  ;;  %v2402_v62 = vpop.permute.xlu0 %2401 }
 0x8e2   : > { %3860 = vmatprep.subr.mxu0 %v3674_v52 }
 0x8e5   : > { %v2480_v3 = vpop.permute.xlu0 %2479 }
 0x92e   : > { %v2144_v42 = vpop.xlane.xlu1 %2143 }
 0x92f   : > { %v2148_v43 = vsub.f32 %v2061_v32, %v2144_v42 }
 0x931   : > { %v2150_v44 = vmul.f32 1.442695, %v2148_v43 }
 0x932   : > { %v2147_v45 = vpop.xlane.xlu1 %2146 }
 0x933   : > { %4180 = vpow2.f32 %v2150_v44  ;;  %v2149_v46 = vsub.f32 %v2139_v36, %v2147_v45 }
 0x935   : > { %v2152_v47 = vmul.f32 1.442695, %v2149_v46 }
 0x937   : > { %4182 = vpow2.f32 %v2152_v47 }
 0x93d   : > { %v4181_v48 = vpop.eup %4180 }
 0x93e   : > { %v2154_v49 = vsel %vm1165_vm3, %v4181_v48, 0.0 }
 0x93f   : > { %2155 = vadd.xlane.f32.xlu1 %v2154_v49 }
 0x941   : > { %v4183_v51 = vpop.eup %4182 }
 0x942   : > { %v2157_v50 = vsel %vm1165_vm3, %v4183_v51, 0.0 }
 0x943   : > { %2158 = vadd.xlane.f32.xlu1 %v2157_v50 }
 0x954   : > { %2240 = vrot.lane.b32.xlu1 %v5604_v15, %s4854_s30 }
 0x9cc   : > { %v2156_v53 = vpop.xlane.xlu1 %2155 }
 0x9cd   : > { %4184 = vrcp.f32 %v2156_v53 }
 0x9d0   : > { %v2159_v54 = vpop.xlane.xlu1 %2158 }
 0x9d1   : > { %4186 = vrcp.f32 %v2159_v54  ;;  %v2970_v54 = vld [vmem:[%s5562_s11] sm:$0xff] }
 0x9d4   : > { %v2241_v55 = vpop.permute.xlu1 %2240 }
 0x9d5   : > { %3856 = vmatpush3.msra.mxu1 %v2241_v55  ;;  %v2971_v55 = vld [vmem:[%s5562_s11 + $0x8] sm:$0xff] }
 0x9d6   : > { %3865 = vmatprep.subr.mxu1 %v4845_v10 }
 0x9d7   : > { %v4185_v57 = vpop.eup %4184 }
 0x9d8   : > { %v2162_v58 = vmul.f32 %v4185_v57, %v4181_v48  ;;  %v3947_v57 = vpack.c.bf16 %v2971_v55, %v2970_v54 }
 0x9da   : > { %3853 = vmatmul.mubr.msk.f32.vlgmr.msra.gmra.mrb[8].mxu0 %vm1165_vm3, %v2162_v58  ;;  %v2973_v58 = vld [vmem:[%s5562_s11 + $0x18] sm:$0xff] }
 0x9db   : > { %v4187_v59 = vpop.eup %4186  ;;  %3861 = vmatpush3.msra.mxu0 %v3674_v52  ;;  %v2879_v52 = vld [vmem:[%s5553_s1 + $0x18] sm:$0xff] }
 0x9dc   : > { %v2163_v61 = vmul.f32 %v4187_v59, %v4183_v51  ;;  %3870 = vmatprep.subr.mxu0 %v4845_v10  ;;  %v2878_v51 = vld [vmem:[%s5553_s1 + $0x10] sm:$0xff] }
 0x9dd   : > { %v3943_v53 = vpack.c.bf16 %v2879_v52, %v2878_v51 }
 0x9de   : > { %3858 = vmatmul.mubr.msk.f32.vlgmr.msra.gmra.mrb[16].mxu1 %vm1165_vm3, %v2163_v61  ;;  %v2975_v61 = vld [vmem:[%s5562_s11 + $0x28] sm:$0xff] }
 0x9df   : > { %3866 = vmatpush3.xpose.msk.msra.mxu1 %vm1165_vm3, %v2404_v56  ;;  %3867 = vmatprep.mubr.msk.f32.mxu1 %vm4846_vm2, %v4845_v10  ;;  %v2972_v56 = vld [vmem:[%s5562_s11 + $0x10] sm:$0xff] }
 0x9e0   : > { %3875 = vmatprep.subr.mxu1 %v4845_v10  ;;  %v3951_v59 = vpack.c.bf16 %v2973_v58, %v2972_v56 }
 0x9e2   : > { %3868 = vmatmul.mubr.msk.f32.vlgmr.msra.gmra.mrb[18].mxu1 %vm1165_vm3, %v2402_v62 }
 0x9e3   : > { %3877 = vmatprep.mubr.msk.f32.mxu1 %vm4846_vm2, %v4845_v10 }
 0xaad   : > { %v2236_v63 = vpop.f32.mrb[8].mxu0 }
 0xaae   : > { %v3854_v0 = vpop.f32.mrb[9].mxu0  ;;  %3862 = vmatprep.mubr.msk.f32.mxu0 %vm1165_vm3, %v2236_v63 }
 0xab1   : > { %v2312_v1 = vpop.f32.mrb[16].mxu1 }
 0xab2   : > { %v3859_v2 = vpop.f32.mrb[17].mxu1  ;;  %3863 = vmatmul.mubr.msk.f32.vlgmr.msra.gmra.mrb[6].mxu0 %vm1165_vm3, %v2312_v1 }
 0xab3   : > { %3871 = vmatpush3.xpose.msk.msra.mxu0 %vm1165_vm3, %v2482_v60  ;;  %3872 = vmatprep.mubr.msk.f32.mxu0 %vm4846_vm2, %v4845_v10  ;;  %v2974_v60 = vld [vmem:[%s5562_s11 + $0x20] sm:$0xff] }
 0xab4   : > { %3880 = vmatprep.subr.mxu0 %v4845_v10  ;;  %v3955_v62 = vpack.c.bf16 %v2975_v61, %v2974_v60 }
 0xab5   : > { %v2475_v4 = vpop.f32.mrb[18].mxu1 }
 0xab6   : > { %v2476_v5 = vadd.f32 %v5622_v19, %v2475_v4  ;;  %v3869_v6 = vpop.f32.mrb[19].mxu1  ;;  %3873 = vmatmul.mubr.msk.f32.vlgmr.msra.gmra.mrb[10].mxu0 %vm1165_vm3, %v2480_v3 }
 0xab7   : > { %3882 = vmatprep.mubr.msk.f32.mxu0 %vm4846_vm2, %v4845_v10 }
 0xab8   : > { %v2557_v8 = vsel %vm1165_vm3, %v2476_v5, -inf }
 0xab9   : > { %2558 = vmax.xlane.f32.xlu1 %v2557_v8 }
 0xb46   : > { %v2559_v11 = vpop.xlane.xlu1 %2558 }
 0xb47   : > { %v2563_v12 = vsub.f32 %v2476_v5, %v2559_v11 }
 0xb49   : > { %v2565_v13 = vmul.f32 1.442695, %v2563_v12 }
 0xb4b   : > { %4188 = vpow2.f32 %v2565_v13 }
 0xb55   : > { %v4189_v19 = vpop.eup %4188 }
 0xb56   : > { %v2569_v21 = vsel %vm1165_vm3, %v4189_v19, 0.0 }
 0xb89   : > { %v2553_v16 = vpop.f32.mrb[10].mxu0 }
 0xb8a   : > { %v2554_v17 = vadd.f32 %v5625_v23, %v2553_v16  ;;  %v3874_v18 = vpop.f32.mrb[11].mxu0 }
 0xb8c   : > { %v2560_v20 = vsel %vm1165_vm3, %v2554_v17, -inf }
 0xb8d   : > { %2561 = vmax.xlane.f32.xlu0 %v2560_v20 }
 0xb91   : > { %2570 = vadd.xlane.f32.xlu0 %v2569_v21  ;;  %v3687_v21 = vld [vmem:[%s882_s21] ss:$0 sm:$0xff] }
 0xba7   : > { %2579 = vrot.lane.b32.xlu0 %v5601_v14, %s4857_s19 }
 0xc1a   : > { %v2562_v10 = vpop.xlane.xlu0 %2561 }
 0xc1b   : > { %v2564_v22 = vsub.f32 %v2554_v17, %v2562_v10 }
 0xc1d   : > { %v2567_v24 = vmul.f32 1.442695, %v2564_v22 }
 0xc1e   : > { %v2571_v25 = vpop.xlane.xlu0 %2570 }
 0xc1f   : > { %4190 = vpow2.f32 %v2567_v24  ;;  %v3688_v24 = vld [vmem:[%s890_s24] ss:$0 sm:$0xff] }
 0xc20   : > { %4192 = vrcp.f32 %v2571_v25 }
 0xc22   : > { %v2580_v26 = vpop.permute.xlu0 %2579 }
 0xc23   : > { %3876 = vmatpush3.msra.mxu1 %v2580_v26 }
 0xc29   : > { %v4191_v23 = vpop.eup %4190 }
 0xc2a   : > { %v4193_v27 = vpop.eup %4192  ;;  %v2572_v28 = vsel %vm1165_vm3, %v4191_v23, 0.0 }
 0xc2b   : > { %v2577_v29 = vmul.f32 %v4193_v27, %v4189_v19  ;;  %2573 = vadd.xlane.f32.xlu1 %v2572_v28 }
 0xc2d   : > { %3878 = vmatmul.mubr.msk.f32.vlgmr.msra.gmra.mrb[20].mxu1 %vm1165_vm3, %v2577_v29  ;;  %v2976_v29 = vld [vmem:[%s5562_s11 + $0x30] sm:$0xff] }
 0xc3c   : > { %2655 = vrot.lane.b32.xlu1 %v5604_v15, %s4857_s19  ;;  %v3686_v15 = vld [vmem:[%s874_s23] ss:$0 sm:$0xff] }
 0xcb8   : > { %v2574_v14 = vpop.xlane.xlu1 %2573 }
 0xcb9   : > { %4194 = vrcp.f32 %v2574_v14  ;;  %v2977_v14 = vld [vmem:[%s5562_s11 + $0x38] sm:$0xff] }
 0xcbc   : > { %v2656_v31 = vpop.permute.xlu1 %2655 }
 0xcbd   : > { %3881 = vmatpush3.msra.mxu0 %v2656_v31  ;;  %v3689_v31 = vld [vmem:[%s907_s22] ss:$0 sm:$0xff] }
 0xcbe   : > { %3885 = vmatprep.subr.mxu0 %v3683_v30 }
 0xcc3   : > { %v4195_v32 = vpop.eup %4194 }
 0xcc4   : > { %v2578_v33 = vmul.f32 %v4195_v32, %v4191_v23 }
 0xcc6   : > { %3883 = vmatmul.mubr.msk.f32.vlgmr.msra.gmra.mrb[12].mxu0 %vm1165_vm3, %v2578_v33 }
 0xcc7   : > { %3886 = vmatpush3.msra.mxu0 %v3683_v30  ;;  %v3959_v30 = vpack.c.bf16 %v2977_v14, %v2976_v29 }
 0xcc8   : > { %3948 = vmatprep.subr.bf16.mxu0 %v3947_v57 }
 0xd00   : > { %v2651_v34 = vpop.f32.mrb[20].mxu1 }
 0xd01   : > { %v3879_v35 = vpop.f32.mrb[21].mxu1  ;;  %3887 = vmatprep.mubr.msk.f32.mxu0 %vm1165_vm3, %v2651_v34 }
 0xd99   : > { %v2727_v36 = vpop.f32.mrb[12].mxu0 }
 0xd9a   : > { %v3884_v37 = vpop.f32.mrb[13].mxu0  ;;  %3888 = vmatmul.mubr.msk.f32.vlgmr.msra.gmra.mrb[6].mxu0 %vm1165_vm3, %v2727_v36 }
 0xd9b   : > { %3950 = vmatpush3.bf16.msra.mxu0 %v3947_v57 }
 0xd9c   : > { %3952 = vmatprep.subr.bf16.mxu0 %v3951_v59 }
 0xd9f   : > { %3954 = vmatpush3.bf16.msra.mxu0 %v3951_v59 }
 0xda0   : > { %3956 = vmatprep.subr.bf16.mxu0 %v3955_v62 }
 0xda3   : > { %3958 = vmatpush3.bf16.msra.mxu0 %v3955_v62 }
 0xda4   : > { %3960 = vmatprep.subr.bf16.mxu0 %v3959_v30 }
 0xda7   : > { %3962 = vmatpush3.bf16.msra.mxu0 %v3959_v30 }
 0xe6d   : > { %v3889_v38 = vpop.f32.mrb[6].mxu0 }
 0xe6e   : > { %v2824_v39 = vadd.f32 %v3889_v38, %v3686_v15  ;;  %v2805_v40 = vpop.f32.mrb[7].mxu0 }
 0xe6f   : > { %v2823_v41 = vadd.f32 %v3686_v15, %v2805_v40  ;;  %v3692_v15 = vld [vmem:[%s924_s20] ss:$0 sm:$0xff] }
 0xe70   : > { %v2826_v42 = vadd.f32 %v2824_v39, %v5589_v9  ;;  %v2876_v9 = vld [vmem:[%s5553_s1] sm:$0xff] }
 0xe71   : > { %v2825_v43 = vadd.f32 %v2823_v41, %v5585_v7  ;;  %v2877_v7 = vld [vmem:[%s5553_s1 + $0x8] sm:$0xff] }
 0xe72   : > { %v2832_v44 = vsel %vm1066_vm1, %v2826_v42, 0.0  ;;  %v2839_v47 = vmul.f32 %v2826_v42, %v2826_v42  ;;  %v3939_v50 = vpack.c.bf16 %v2877_v7, %v2876_v9 }
 0xe73   : > { %2833 = vadd.xlane.f32.xlu0 %v2832_v44  ;;  %v2829_v45 = vsel %vm1066_vm1, %v2825_v43, 0.0  ;;  %v2838_v46 = vmul.f32 %v2825_v43, %v2825_v43 }
 0xe74   : > { %2830 = vadd.xlane.f32.xlu1 %v2829_v45  ;;  %v2843_v49 = vsel %vm1066_vm1, %v2839_v47, 0.0  ;;  %3940 = vmatprep.subr.bf16.mxu1 %v3939_v50 }
 0xe75   : > { %v2840_v48 = vsel %vm1066_vm1, %v2838_v46, 0.0  ;;  %3942 = vmatpush3.bf16.msra.mxu1 %v3939_v50 }
 0xe76   : > { %3944 = vmatprep.subr.bf16.mxu1 %v3943_v53 }
 0xe77   : > { %2841 = vadd.xlane.f32.xlu0 %v2840_v48 }
 0xe78   : > { %2844 = vadd.xlane.f32.xlu1 %v2843_v49 }
 0xe79   : > { %3946 = vmatpush3.bf16.msra.mxu1 %v3943_v53 }
 0xf00   : > { %v2834_v63 = vpop.xlane.xlu0 %2833 }
 0xf01   : > { %v2831_v0 = vpop.xlane.xlu1 %2830  ;;  %v2837_v1 = vmul.f32 0.03125, %v2834_v63 }
 0xf02   : > { %v2836_v2 = vmul.f32 0.03125, %v2831_v0 }
 0xf03   : > { %v2849_v8 = vmul.f32 %v2837_v1, %v2837_v1  ;;  %v2853_v19 = vsub.f32 %v2826_v42, %v2837_v1  ;;  %v3695_v1 = vld [vmem:[%s932_s10] ss:$0 sm:$0xff] }
 0xf04   : > { %v2848_v3 = vmul.f32 %v2836_v2, %v2836_v2  ;;  %v2842_v4 = vpop.xlane.xlu0 %2841  ;;  %v2852_v18 = vsub.f32 %v2825_v43, %v2836_v2 }
 0xf05   : > { %v2846_v5 = vmul.f32 0.03125, %v2842_v4  ;;  %v2845_v6 = vpop.xlane.xlu1 %2844  ;;  %v3696_v4 = vld [vmem:[%s940_s27] ss:$0 sm:$0xff] }
 0xf06   : > { %v2847_v11 = vmul.f32 0.03125, %v2845_v6 }
 0xf07   : > { %v2850_v12 = vsub.f32 %v2846_v5, %v2848_v3 }
 0xf08   : > { %v2851_v13 = vsub.f32 %v2847_v11, %v2849_v8 }
 0xf09   : > { %v2854_v16 = vadd.f32 1e-05, %v2850_v12 }
 0xf0a   : > { %v2855_v17 = vadd.f32 1e-05, %v2851_v13  ;;  %v3123_v13 = vld [vmem:[#allocation8] sm:$0xff] (!%p3697_p5) }
 0xf0b   : > { %4196 = vrsqrt.f32 %v2854_v16  ;;  %v3124_v16 = vld [vmem:[#allocation8 + $0x8] sm:$0xff] (!%p3697_p5) }
 0xf0c   : > { %4198 = vrsqrt.f32 %v2855_v17  ;;  %v4858_v17 = vmov (!%p3697_p5), 0  }
 0xf0d   : > { %4204 = vset.pattern.permute.xlu0 (!%p3697_p5), %v4858_v17  ;;  %4205 = vset.pattern.permute.xlu1 (!%p3697_p5), %v4858_v17 }
 0xf15   : > { %v4197_v20 = vpop.eup %4196 }
 0xf16   : > { %v4199_v10 = vpop.eup %4198  ;;  %v2858_v22 = vmul.f32 %v4197_v20, %v2852_v18  ;;  %v3152_v18 = vsel (!%p3697_p5), %vm3151_vm5, %v3123_v13, 0.0  ;;  %v3159_v20 = vsel (!%p3697_p5), %vm3151_vm5, %v3124_v16, 0.0 }
 0xf17   : > { %v2859_v25 = vmul.f32 %v4199_v10, %v2853_v19  ;;  %v3153_v19 = vrot.slane (!%p3697_p5), %v3152_v18, 4 }
 0xf18   : > { %v2866_v26 = vmul.f32 %v3687_v21, %v2858_v22 }
 0xf19   : > { %v2867_v23 = vmul.f32 %v3687_v21, %v2859_v25  ;;  %v3160_v21 = vrot.slane (!%p3697_p5), %v3159_v20, 4  ;;  %v3154_v10 = vadd.f32 (!%p3697_p5), %v3153_v19, %v3152_v18 }
 0xf1a   : > { %v2874_v27 = vadd.f32 %v3688_v24, %v2866_v26 }
 0xf1b   : > { %v2875_v28 = vadd.f32 %v3688_v24, %v2867_v23  ;;  %v3161_v22 = vadd.f32 (!%p3697_p5), %v3160_v21, %v3159_v20  ;;  %v3155_v24 = vrot.slane (!%p3697_p5), %v3154_v10, 2 }
 0xf1c   : > { %3898 = vmatprep.mubr.msk.f32.mxu1 %vm1066_vm1, %v2874_v27 }
 0xf1d   : > { %3899 = vmatmul.mubr.msk.f32.vlgmr.msra.gmra.mrb[22].mxu1 %vm1066_vm1, %v2875_v28  ;;  %v3162_v25 = vrot.slane (!%p3697_p5), %v3161_v22, 2  ;;  %v3156_v23 = vadd.f32 (!%p3697_p5), %v3155_v24, %v3154_v10 }
 0xf1f   : > { %v3163_v26 = vadd.f32 (!%p3697_p5), %v3162_v25, %v3161_v22 }
 0xff0   : > { %v3900_v32 = vpop.f32.mrb[22].mxu1 }
 0xff1   : > { %v2965_v33 = vadd.f32 %v3900_v32, %v3689_v31  ;;  %v2959_v34 = vpop.f32.mrb[23].mxu1  ;;  %v3182_v32 = vld [vmem:[#allocation27] sm:$0xff] (!%p3697_p5) }
 0xff2   : > { %v2960_v35 = vadd.f32 %v3689_v31, %v2959_v34  ;;  %v3184_v34 = vld [vmem:[#allocation27 + $0x10] sm:$0xff] (!%p3697_p5) }
 0xff3   : > { %v2969_v37 = vmax.f32 %v2965_v33, 0.0  ;;  %v3183_v33 = vld [vmem:[#allocation27 + $0x8] sm:$0xff] (!%p3697_p5) }
 0xff4   : > { %v2968_v36 = vmax.f32 %v2960_v35, 0.0  ;;  %v4859_v35 = vmov (!%p3697_p5), 0.0|0.0  }
 0xff5   : > { %3963 = vmatprep.subr.bf16.mxu0 (!%p3697_p5), %v4859_v35 }
 0xff6   : > { %3917 = vmatprep.mubr.msk.f32.mxu0 %vm2985_vm4, %v2968_v36  ;;  %v3964_v36 = vpack.c.bf16 (!%p3697_p5), %v3183_v33, %v3182_v32 }
 0xff7   : > { %3918 = vmatmul.mubr.msk.f32.vlgmr.msra.gmra.mrb[14].mxu0 %vm2985_vm4, %v2969_v37  ;;  %v3185_v37 = vld [vmem:[#allocation27 + $0x18] sm:$0xff] (!%p3697_p5) }
 0xff8   : > { %3965 = vmatpush3.bf16.msra.mxu0 (!%p3697_p5), %v3964_v36 }
 0xff9   : > { %3966 = vmatprep.subr.bf16.mxu0 (!%p3697_p5), %v4859_v35 }
0x10ca   : > { %v3919_v38 = vpop.f32.mrb[14].mxu0 }
0x10cb   : > { %v3064_v39 = vadd.f32 %v3919_v38, %v3692_v15  ;;  %v3058_v40 = vpop.f32.mrb[15].mxu0  ;;  %v3967_v38 = vpack.c.bf16 (!%p3697_p5), %v3185_v37, %v3184_v34 }
0x10cc   : > { %v3059_v41 = vadd.f32 %v3692_v15, %v3058_v40  ;;  %v4861_v15 = vmov (!%p3697_p5), 0.0  }
0x10cd   : > { %v3068_v42 = vadd.f32 %v3064_v39, %v2875_v28  ;;  %v3164_v28 = vrot.slane (!%p3697_p5), %v3163_v26, 1  ;;  %3928 = vmatprep.mubr.msk.f32.mxu0 (!%p3697_p5), %vm4860_vm6, %v4861_v15  ;;  %3968 = vmatpush3.bf16.msra.mxu0 (!%p3697_p5), %v3967_v38 }
0x10ce   : > { %v3067_v43 = vadd.f32 %v3059_v41, %v2874_v27  ;;  %v3157_v27 = vrot.slane (!%p3697_p5), %v3156_v23, 1 }
0x10cf   : > { %v3074_v44 = vsel %vm1066_vm1, %v3068_v42, 0.0  ;;  %v3080_v45 = vmul.f32 %v3068_v42, %v3068_v42  ;;  %v3165_v14 = vadd.f32 (!%p3697_p5), %v3164_v28, %v3163_v26 }
0x10d0   : > { %3075 = vadd.xlane.f32.xlu1 %v3074_v44  ;;  %v3071_v46 = vsel %vm1066_vm1, %v3067_v43, 0.0  ;;  %v3079_v47 = vmul.f32 %v3067_v43, %v3067_v43  ;;  %v3158_v29 = vadd.f32 (!%p3697_p5), %v3157_v27, %v3156_v23 }
0x10d1   : > { %3072 = vadd.xlane.f32.xlu0 %v3071_v46  ;;  %v3084_v48 = vsel %vm1066_vm1, %v3080_v45, 0.0  ;;  %v3167_v31 = vmax.f32 (!%p3697_p5), %v3165_v14, 1e-08 }
0x10d2   : > { %v3081_v49 = vsel %vm1066_vm1, %v3079_v47, 0.0  ;;  %v3166_v30 = vmax.f32 (!%p3697_p5), %v3158_v29, 1e-08 }
0x10d4   : > { %3085 = vadd.xlane.f32.xlu1 %v3084_v48 }
0x10d5   : > { %3082 = vadd.xlane.f32.xlu0 %v3081_v49 }
0x10e5   : > { %3170 = vperm.xlu1 (!%p3697_p5), %4205, %v3166_v30  }
0x10e9   : > { %3175 = vperm.xlu1 (!%p3697_p5), %4205, %v3167_v31  }
0x10eb   : > { %3127 = vperm.xlu0 (!%p3697_p5), %4204, %v3123_v13  }
0x10ef   : > { %3132 = vperm.xlu0 (!%p3697_p5), %4204, %v3124_v16  }
0x115d   : > { %v3076_v9 = vpop.xlane.xlu1 %3075 }
0x115e   : > { %v3078_v7 = vmul.f32 0.03125, %v3076_v9  ;;  %v3073_v51 = vpop.xlane.xlu0 %3072 }
0x115f   : > { %v3077_v50 = vmul.f32 0.03125, %v3073_v51 }
0x1160   : > { %v3090_v53 = vmul.f32 %v3078_v7, %v3078_v7  ;;  %v3094_v62 = vsub.f32 %v3068_v42, %v3078_v7 }
0x1161   : > { %v3086_v52 = vpop.xlane.xlu1 %3085  ;;  %v3089_v56 = vmul.f32 %v3077_v50, %v3077_v50  ;;  %v3093_v0 = vsub.f32 %v3067_v43, %v3077_v50 }
0x1162   : > { %v3088_v54 = vmul.f32 0.03125, %v3086_v52  ;;  %v3083_v55 = vpop.xlane.xlu0 %3082 }
0x1163   : > { %v3087_v57 = vmul.f32 0.03125, %v3083_v55 }
0x1164   : > { %v3092_v58 = vsub.f32 %v3088_v54, %v3090_v53 }
0x1165   : > { %v3091_v59 = vsub.f32 %v3087_v57, %v3089_v56  ;;  %v3171_v49 = vpop.permute.xlu1 (!%p3697_p5), %3170 }
0x1166   : > { %v3096_v60 = vadd.f32 1e-05, %v3092_v58 }
0x1167   : > { %v3095_v61 = vadd.f32 1e-05, %v3091_v59 }
0x1168   : > { %4200 = vrsqrt.f32 %v3096_v60 }
0x1169   : > { %4202 = vrsqrt.f32 %v3095_v61  ;;  %v3176_v51 = vpop.permute.xlu1 (!%p3697_p5), %3175 }
0x116a   : > { %v3128_v39 = vpop.permute.xlu0 (!%p3697_p5), %3127  ;;  %4206 = vrcp.f32 (!%p3697_p5), %v3171_v49 }
0x116b   : > { %4208 = vrcp.f32 (!%p3697_p5), %v3176_v51 }
0x116e   : > { %v3133_v41 = vpop.permute.xlu0 (!%p3697_p5), %3132 }
0x1172   : > { %v4201_v63 = vpop.eup %4200 }
0x1173   : > { %v4203_v2 = vpop.eup %4202  ;;  %v3100_v3 = vmul.f32 %v4201_v63, %v3094_v62  ;;  %v3698_v62 = vld [vmem:[#allocation29] ss:$0 sm:$0xff] (!%p3697_p5) }
0x1174   : > { %v3099_v5 = vmul.f32 %v4203_v2, %v3093_v0  ;;  %3122 = sbr.rel (%p3697_p5) target bundleno = 4707 (0x1263), region = 164  ;;  %v4207_v55 = vpop.eup (!%p3697_p5), %4206 }
0x1175   : > { %v3108_v6 = vmul.f32 %v3695_v1, %v3100_v3  ;;  %v4209_v58 = vpop.eup (!%p3697_p5), %4208 }
0x1176   : > { %v3107_v8 = vmul.f32 %v3695_v1, %v3099_v5 }
0x1177   : > { %v3116_v11 = vadd.f32 %v3696_v4, %v3108_v6 }
0x1178   : > { %v3115_v12 = vadd.f32 %v3696_v4, %v3107_v8 }
0x1179   : > { %3118 = vst.msk [vmem:[#allocation2 + $0x8] sm:$0xff] %vm1066_vm1, %v3116_v11  ;;  %v3136_v43 = vmul.f32 (!%p3697_p5), %v3133_v41, %v3116_v11 }
0x117a   : > { %3117 = vst.msk [vmem:[#allocation2] sm:$0xff] %vm1066_vm1, %v3115_v12  ;;  %v3135_v40 = vmul.f32 (!%p3697_p5), %v3128_v39, %v3115_v12 }
0x117b   : > { %v3144_v44 = vsel %vm1066_vm1, %v3136_v43, 0.0 }
0x117c   : > { %v3137_v42 = vsel %vm1066_vm1, %v3135_v40, 0.0  ;;  %v3145_v46 = vrot.slane %v3144_v44, 4 }
0x117d   : > { %v3138_v45 = vrot.slane %v3137_v42, 4 }
0x117e   : > { %v3146_v48 = vadd.f32 %v3145_v46, %v3144_v44 }
0x117f   : > { %v3139_v47 = vadd.f32 %v3138_v45, %v3137_v42 }
0x1180   : > { %v3147_v7 = vrot.slane %v3146_v48, 2 }
0x1181   : > { %v3140_v9 = vrot.slane %v3139_v47, 2 }
0x1182   : > { %v3148_v52 = vadd.f32 %v3147_v7, %v3146_v48 }
0x1183   : > { %v3141_v50 = vadd.f32 %v3140_v9, %v3139_v47 }
0x1184   : > { %v3149_v54 = vrot.slane %v3148_v52, 1 }
0x1185   : > { %v3142_v53 = vrot.slane %v3141_v50, 1 }
0x1186   : > { %v3150_v57 = vadd.f32 %v3149_v54, %v3148_v52 }
0x1187   : > { %v3143_v56 = vadd.f32 %v3142_v53, %v3141_v50 }
0x1188   : > { %v3181_v60 = vmul.f32 %v4209_v58, %v3150_v57 }
0x1189   : > { %v3179_v59 = vmul.f32 %v4207_v55, %v3143_v56 }
0x118b   : > { %v3196_v61 = vsel %vm3195_vm7, %v3181_v60, %v3179_v59 }
0x118c   : > { %3929 = vmatmul.mubr.msk.f32.vlgmr.msra.gmra.mrb[0].mxu0 %vm1066_vm1, %v3196_v61 }
0x125f   : > { %v3265_v63 = vpop.f32.mrb[0].mxu0 }
0x1260   : > { %v3266_v0 = vadd.f32 %v3698_v62, %v3265_v63  ;;  %v3930_v1 = vpop.f32.mrb[1].mxu0 }
0x1262   : > { %3269 = vst [vmem:[#allocation30] sm:$0x3] %v3266_v0 }
0x1263 PF: > { %s5969_s3 = sld [smem:[#allocation43_spill]]  ;;  %s4862_s23 = smov [#allocation30]  }
0x1264   : > { %s3279_s21 = sshll.u32 %s4862_s23, 4  ;;  %s3280_s21 = int_to_ptr.vmem [resolvable:$true] %s3279_s21 }
0x1265   : > { %s4710_s24 = scalar_lea.vmem %s3280_s21, 32  ;;  %p4717_p0 = scmp.lt.s32.totalorder %s3280_s21, %s3280_s21 }
0x1266   : > { %p4711_p1 = scmp.ne.s32.totalorder %s3280_s21, %s4710_s24  ;;  %p4718_p12 = scmp.lt.s32.totalorder %s4710_s24, %s4710_s24 }
0x1268   : > { %p4719_p2 = por %p4718_p12, %p4717_p0 }
0x1269   : > { %p4087_p11 = scmp.eq.s32.totalorder %s5969_s3, 1 }
0x126b   : > { %p4712_p6 = pnand %p4711_p1, %p4087_p11 }
0x126d   : > { %p4713_p13 = pneg %p4712_p6 }
0x126f   : > { %p4720_p9 = pnand %p4719_p2, %p4713_p13 }
0x1271   : > { %4723 = shalt.err (!%p4720_p9)
}
0x1272   : > { %s5970_s11 = sld [smem:[#allocation63_spill]] }
0x1278   : > { %s4724_s20 = scalar_lea.hbm %s5970_s11, 32 }
0x1279   : > { %p4725_p10 = scmp.ne.s32.totalorder %s5970_s11, %s4724_s20  ;;  %p4730_p7 = scmp.lt.u32.totalorder %s4724_s20, %s5970_s11 }
0x127b   : > { %p4726_p8 = pnand %p4725_p10, %p4087_p11 }
0x127d   : > { %p4727_p4 = pneg %p4726_p8 }
0x127f   : > { %p4732_p3 = pnand %p4730_p7, %p4727_p4 }
0x1281   : > { %4735 = shalt.err (!%p4732_p3)
}
0x1282   : > { %4020 = dma.vmem_to_hbm [thread:$0]  (%p4087_p11), %s3280_s21, 32, %s5970_s11, [#allocation5]  }
0x1283   : > { %4797 = dma.done.wait (%p4087_p11), [#allocation5], 32  }
0x1284   : > { %4799 = vsyncadd (%p4087_p11), [#allocation5], 4294967264 }
0x1285 PF: > { %s49_s29 = sadd.s32 1, %s4822_s29   ;;  %s5971_s24 = sld [smem:[#allocation41_spill]] }
0x1286   : > { %p46_p5 = scmp.ge.s32.totalorder %s49_s29, 4   ;;  %s5972_s16 = sld [smem:[#allocation46_spill]] }
0x1287   : > { %s5973_s25 = smov %s4810_s26  ;;  %s5974_s26 = smov %s5085_s8 }
0x1288   : > { %s5975_s27 = smov %s4818_s28  ;;  %48 = sbr.rel (!%p46_p5) target bundleno = 36 (0x24), region = 292 }
0x128c   : > { %s5976_s28 = smov %s5972_s16 }
0x128f   :  { %3292 = vsyncpa [#allocation4], 1 }
0x1290   :  { %3294 = vsyncpa [#allocation4 + $0x1], 1 }
0x1291   :  { %3295 = vsyncpa [#allocation7], 1 }
0x1292   :  { %3296 = vsyncpa [#allocation10], 1 }
0x1293   :  { %3298 = vsyncpa [#allocation10 + $0x1], 1 }
0x1294   :  { %3299 = vsyncpa [#allocation13], 1 }
0x1295   :  { %3301 = vsyncpa [#allocation13 + $0x1], 1 }
0x1296   :  { %3302 = vsyncpa [#allocation16], 1 }
0x1297   :  { %3304 = vsyncpa [#allocation16 + $0x1], 1 }
0x1298   :  { %3305 = vsyncpa [#allocation19], 1 }
0x1299   :  { %3307 = vsyncpa [#allocation19 + $0x1], 1 }
0x129a   :  { %3308 = vsyncpa [#allocation22], 1 }
0x129b   :  { %3310 = vsyncpa [#allocation22 + $0x1], 1 }
0x129c   :  { %3311 = vsyncpa [#allocation25], 1 }
0x129d   :  { %3313 = vsyncpa [#allocation25 + $0x1], 1 }
0x129e   :  { %3314 = vsyncpa [#allocation28], 1 }
0x129f   :  { %3315 = vsyncpa [#allocation5], 1 }
0x12a0   :  { %3317 = vsyncpa [#allocation5 + $0x1], 1 }

</bundles_post_ra>
